<compile_context>
chip_gen: v7x
topology: tpu7x:2x2x1
jax: 0.10.0
libtpu: 0.0.40
codegen_flags: <defaults>
</compile_context>

<pallas_src>
import functools
import math

import jax
import jax.numpy as jnp
import numpy as np
from jax import lax
from jax.experimental import pallas as pl
from jax.experimental.pallas import tpu as pltpu


# ----------------------------- helpers ------------------------------------

def _gelu(x, exact: bool):
    if exact:
        # PyTorch nn.GELU() default: exact erf-based GELU.
        return 0.5 * x * (1.0 + lax.erf(x * (1.0 / math.sqrt(2.0))))
    # Fallback only if erf does not lower on this Mosaic build.
    return jax.nn.gelu(x, approximate=True)


def _layer_norm(v, w, b, eps=1e-5):
    # Single-pass stats (E[x], E[x^2]) -> one fewer XLU reduction per LN.
    mu = jnp.mean(v, axis=-1, keepdims=True)
    ms = jnp.mean(v * v, axis=-1, keepdims=True)
    var = ms - mu * mu
    return (v - mu) * lax.rsqrt(var + eps) * w + b


# ----------------------------- kernel --------------------------------------

def block_kernel(x_ref,
                 ln1_w_ref, ln1_b_ref,
                 qw_ref, kw_ref, vw_ref,        # (H, C, D) head-major, Q pre-scaled
                 pw_ref, proj_b_ref,            # (H, D, C), (1, C)
                 ln2_w_ref, ln2_b_ref,
                 fc1_w_ref, fc1_b_ref, fc2_w_ref, fc2_b_ref,
                 o_ref, *, compute_dtype, exact_gelu, approx_recip):
    N, C = x_ref.shape                  # full token count for this batch element
    tq = o_ref.shape[0]                 # query-token tile handled by this grid step
    H = qw_ref.shape[0]

    # Hoisted parameter loads (JAX does not CSE broadcast_in_dim).
    w1, b1 = ln1_w_ref[...], ln1_b_ref[...]
    w2, b2 = ln2_w_ref[...], ln2_b_ref[...]
    proj_b = proj_b_ref[...]
    fc1_b, fc2_b = fc1_b_ref[...], fc2_b_ref[...]

    # ---------------- Attention branch ----------------
    x_full = x_ref[...].astype(jnp.float32)                       # (N, C)
    y_full = _layer_norm(x_full, w1, b1)                          # (N, C) f32

    if tq == N:                                                   # static branch
        x_q, y_q = x_full, y_full
    else:
        row0 = pl.multiple_of(pl.program_id(1) * tq, tq)
        x_q = lax.dynamic_slice(x_full, (row0, 0), (tq, C))       # (tq, C)
        y_q = lax.dynamic_slice(y_full, (row0, 0), (tq, C))

    y_kv_c = y_full.astype(compute_dtype)
    y_q_c = y_q.astype(compute_dtype)

    # Broadcast activations over the head (leading batch) dim so every
    # contraction below is a plain leading-batch MXU matmul: no activation
    # slicing, no explicit transposes, full K=C contraction width.
    y_kv_b = jnp.broadcast_to(y_kv_c[None], (H, N, C))
    y_q_b = jnp.broadcast_to(y_q_c[None], (H, tq, C))

    q = jnp.einsum('hnc,hcd->hnd', y_q_b, qw_ref[...],
                   preferred_element_type=jnp.float32).astype(compute_dtype)
    k = jnp.einsum('hmc,hcd->hmd', y_kv_b, kw_ref[...],
                   preferred_element_type=jnp.float32).astype(compute_dtype)
    v = jnp.einsum('hmc,hcd->hmd', y_kv_b, vw_ref[...],
                   preferred_element_type=jnp.float32).astype(compute_dtype)

    # Scores: the 1/sqrt(D) scale is already folded into the Q weights.
    s = jnp.einsum('hnd,hmd->hnm', q, k,
                   preferred_element_type=jnp.float32)            # (H, tq, N)
    s = s - jnp.max(s, axis=-1, keepdims=True)
    p = jnp.exp(s)
    denom = jnp.sum(p, axis=-1, keepdims=True)
    p = (p * pl.reciprocal(denom, approx=approx_recip)).astype(compute_dtype)

    ctx = jnp.einsum('hnm,hmd->hnd', p, v,
                     preferred_element_type=jnp.float32).astype(compute_dtype)

    # Output projection; head reduction is a cheap sum over the leading dim.
    attn_h = jnp.einsum('hnd,hdc->hnc', ctx, pw_ref[...],
                        preferred_element_type=jnp.float32)       # (H, tq, C)
    attn_out = jnp.sum(attn_h, axis=0) + proj_b                   # (tq, C)

    x1 = x_q + attn_out                                           # residual 1 (f32)

    # ---------------- MLP branch ----------------
    z = _layer_norm(x1, w2, b2).astype(compute_dtype)
    hdn = jnp.dot(z, fc1_w_ref[...],
                  preferred_element_type=jnp.float32) + fc1_b
    hdn = _gelu(hdn, exact_gelu).astype(compute_dtype)
    mlp = jnp.dot(hdn, fc2_w_ref[...],
                  preferred_element_type=jnp.float32) + fc2_b

    o_ref[...] = (x1 + mlp).astype(o_ref.dtype)                   # residual 2


# ----------------------------- wrapper --------------------------------------

def vit_block(x, p, num_heads, *, compute_dtype=jnp.bfloat16, exact_gelu=True,
              tq=None):
    B, N, C = x.shape
    H = num_heads
    assert C % H == 0, "dim must be divisible by num_heads"
    D = C // H
    Hm = p["fc1_w"].shape[1]
    scale = D ** (-0.5)
    cdt = jnp.dtype(compute_dtype)

    # ---- head-major weight prep (wrapper-side glue, runs once outside kernel) ----
    qkv_w = p["qkv_w"]                                    # (C, 3C), (in, out) layout
    q_w = qkv_w[:, :C] * scale                            # fold 1/sqrt(D) into Q
    k_w = qkv_w[:, C:2 * C]
    v_w = qkv_w[:, 2 * C:]
    qw_h = q_w.reshape(C, H, D).transpose(1, 0, 2).astype(cdt)   # (H, C, D)
    kw_h = k_w.reshape(C, H, D).transpose(1, 0, 2).astype(cdt)
    vw_h = v_w.reshape(C, H, D).transpose(1, 0, 2).astype(cdt)
    pw_h = p["proj_w"].reshape(H, D, C).astype(cdt)              # (H, D, C)
    fc1_w = p["fc1_w"].astype(cdt)
    fc2_w = p["fc2_w"].astype(cdt)

    # ---- query/token tiling (bounds the (H,tq,N) logits / (tq,4C) hidden in VMEM) ----
    if tq is None:
        tq = N if N <= 256 else 256
    if N % tq != 0 or (tq != N and tq % 8 != 0):
        tq = N   # TODO(synk): pad/mask the token axis for N not a multiple of the tile.
    n_qt = N // tq

    def full(shape):
        return pl.BlockSpec(shape, lambda b, i: (0,) * len(shape))

    kernel = functools.partial(
        block_kernel,
        compute_dtype=cdt,
        exact_gelu=exact_gelu,
        approx_recip=(cdt != jnp.dtype(jnp.float32)),
    )

    return pl.pallas_call(
        kernel,
        out_shape=jax.ShapeDtypeStruct((B, N, C), x.dtype),
        grid=(B, n_qt),
        in_specs=[
            pl.BlockSpec((None, N, C), lambda b, i: (b, 0, 0)),   # x (full sequence)
            full((1, C)), full((1, C)),                           # ln1 w, b
            full((H, C, D)), full((H, C, D)), full((H, C, D)),    # q/k/v weights
            full((H, D, C)), full((1, C)),                        # proj w, b
            full((1, C)), full((1, C)),                           # ln2 w, b
            full((C, Hm)), full((1, Hm)),                         # fc1 w, b
            full((Hm, C)), full((1, C)),                          # fc2 w, b
        ],
        out_specs=pl.BlockSpec((None, tq, C), lambda b, i: (b, i, 0)),
        compiler_params=pltpu.CompilerParams(
            dimension_semantics=("parallel", "parallel"),
        ),
    )(x, p["ln1_w"], p["ln1_b"], qw_h, kw_h, vw_h, pw_h, p["proj_b"],
      p["ln2_w"], p["ln2_b"], fc1_w, p["fc1_b"], fc2_w, p["fc2_b"])


# ----------------------------- pure-JAX reference ----------------------------

def block_reference(x, p, num_heads, exact_gelu=True):
    def ln(v, w, b):
        mu = v.mean(-1, keepdims=True)
        var = ((v - mu) ** 2).mean(-1, keepdims=True)
        return (v - mu) / jnp.sqrt(var + 1e-5) * w + b

    B, N, C = x.shape
    D = C // num_heads
    y = ln(x, p["ln1_w"][0], p["ln1_b"][0])
    qkv = (y @ p["qkv_w"]).reshape(B, N, 3, num_heads, D).transpose(2, 0, 3, 1, 4)
    q, k, v = qkv[0], qkv[1], qkv[2]
    attn = (q @ k.transpose(0, 1, 3, 2)) * D ** (-0.5)
    attn = jax.nn.softmax(attn, axis=-1)
    ctx = (attn @ v).transpose(0, 2, 1, 3).reshape(B, N, C)
    x = x + ctx @ p["proj_w"] + p["proj_b"][0]
    z = ln(x, p["ln2_w"][0], p["ln2_b"][0])
    h = _gelu(z @ p["fc1_w"] + p["fc1_b"][0], exact_gelu)
    return x + h @ p["fc2_w"] + p["fc2_b"][0]


# ----------------------------- main ------------------------------------------

if __name__ == "__main__":
    B, N, dim, num_heads = 2, 8, 32, 4
    mlp_hidden = int(dim * 4.0)

    key = jax.random.PRNGKey(0)
    kx, kp = jax.random.split(key)
    x = jax.random.normal(kx, (B, N, dim), dtype=jnp.float32)

    ks = jax.random.split(kp, 12)
    params = {
        "ln1_w": 1.0 + 0.1 * jax.random.normal(ks[0], (1, dim), jnp.float32),
        "ln1_b": 0.1 * jax.random.normal(ks[1], (1, dim), jnp.float32),
        # stored as (in, out); PyTorch nn.Linear holds (out, in) -- transpose is glue.
        "qkv_w": 0.05 * jax.random.normal(ks[2], (3 * dim, dim), jnp.float32).T,
        "proj_w": 0.05 * jax.random.normal(ks[3], (dim, dim), jnp.float32).T,
        "proj_b": 0.02 * jax.random.normal(ks[4], (1, dim), jnp.float32),
        "ln2_w": 1.0 + 0.1 * jax.random.normal(ks[5], (1, dim), jnp.float32),
        "ln2_b": 0.1 * jax.random.normal(ks[6], (1, dim), jnp.float32),
        "fc1_w": 0.05 * jax.random.normal(ks[7], (mlp_hidden, dim), jnp.float32).T,
        "fc1_b": 0.02 * jax.random.normal(ks[8], (1, mlp_hidden), jnp.float32),
        "fc2_w": 0.05 * jax.random.normal(ks[9], (dim, mlp_hidden), jnp.float32).T,
        "fc2_b": 0.02 * jax.random.normal(ks[10], (1, dim), jnp.float32),
    }

    # 1) f32 compute path -> tight tolerance against the f32 reference.
    exact = True
    try:
        out_f32 = jax.block_until_ready(
            vit_block(x, params, num_heads, compute_dtype=jnp.float32, exact_gelu=True))
    except Exception:
        exact = False
        out_f32 = jax.block_until_ready(
            vit_block(x, params, num_heads, compute_dtype=jnp.float32, exact_gelu=False))

    ref = jax.block_until_ready(block_reference(x, params, num_heads, exact_gelu=exact))
    assert out_f32.shape == (B, N, dim)
    np.testing.assert_allclose(np.asarray(out_f32), np.asarray(ref), rtol=2e-4, atol=2e-4)

    # 2) bf16 MXU-operand path (the performance configuration) -> looser tolerance.
    out_bf16 = jax.block_until_ready(
        vit_block(x, params, num_heads, compute_dtype=jnp.bfloat16, exact_gelu=exact))
    np.testing.assert_allclose(np.asarray(out_bf16), np.asarray(ref), rtol=2e-2, atol=2e-2)

    print("KERNEL_OK")
</pallas_src>

<mosaic_0001>
module attributes {stable_mosaic.version = 11 : i64} {
  func.func @block_kernel(%arg0: i32, %arg1: i32, %arg2: memref<1x8x32xf32, #tpu.memory_space<vmem>>, %arg3: memref<1x32xf32, #tpu.memory_space<vmem>>, %arg4: memref<1x32xf32, #tpu.memory_space<vmem>>, %arg5: memref<4x32x8xf32, #tpu.memory_space<vmem>>, %arg6: memref<4x32x8xf32, #tpu.memory_space<vmem>>, %arg7: memref<4x32x8xf32, #tpu.memory_space<vmem>>, %arg8: memref<4x8x32xf32, #tpu.memory_space<vmem>>, %arg9: memref<1x32xf32, #tpu.memory_space<vmem>>, %arg10: memref<1x32xf32, #tpu.memory_space<vmem>>, %arg11: memref<1x32xf32, #tpu.memory_space<vmem>>, %arg12: memref<32x128xf32, #tpu.memory_space<vmem>>, %arg13: memref<1x128xf32, #tpu.memory_space<vmem>>, %arg14: memref<128x32xf32, #tpu.memory_space<vmem>>, %arg15: memref<1x32xf32, #tpu.memory_space<vmem>>, %arg16: memref<1x8x32xf32, #tpu.memory_space<vmem>>) attributes {dimension_semantics = [#tpu.dimension_semantics<parallel>, #tpu.dimension_semantics<parallel>], iteration_bounds = array<i64: 2, 1>, scalar_prefetch = 0 : i64, scratch_operands = 0 : i64, tpu.core_type = #tpu.core_type<tc>, window_params = [{transform_indices = @transform_0, window_bounds = array<i64: 1, 8, 32>}, {pipeline_mode = #tpu.pipeline_mode<synchronous>, transform_indices = @transform_1, window_bounds = array<i64: 1, 32>}, {pipeline_mode = #tpu.pipeline_mode<synchronous>, transform_indices = @transform_2, window_bounds = array<i64: 1, 32>}, {pipeline_mode = #tpu.pipeline_mode<synchronous>, transform_indices = @transform_3, window_bounds = array<i64: 4, 32, 8>}, {pipeline_mode = #tpu.pipeline_mode<synchronous>, transform_indices = @transform_4, window_bounds = array<i64: 4, 32, 8>}, {pipeline_mode = #tpu.pipeline_mode<synchronous>, transform_indices = @transform_5, window_bounds = array<i64: 4, 32, 8>}, {pipeline_mode = #tpu.pipeline_mode<synchronous>, transform_indices = @transform_6, window_bounds = array<i64: 4, 8, 32>}, {pipeline_mode = #tpu.pipeline_mode<synchronous>, transform_indices = @transform_7, window_bounds = array<i64: 1, 32>}, {pipeline_mode = #tpu.pipeline_mode<synchronous>, transform_indices = @transform_8, window_bounds = array<i64: 1, 32>}, {pipeline_mode = #tpu.pipeline_mode<synchronous>, transform_indices = @transform_9, window_bounds = array<i64: 1, 32>}, {pipeline_mode = #tpu.pipeline_mode<synchronous>, transform_indices = @transform_10, window_bounds = array<i64: 32, 128>}, {pipeline_mode = #tpu.pipeline_mode<synchronous>, transform_indices = @transform_11, window_bounds = array<i64: 1, 128>}, {pipeline_mode = #tpu.pipeline_mode<synchronous>, transform_indices = @transform_12, window_bounds = array<i64: 128, 32>}, {pipeline_mode = #tpu.pipeline_mode<synchronous>, transform_indices = @transform_13, window_bounds = array<i64: 1, 32>}, {transform_indices = @transform_14, window_bounds = array<i64: 1, 8, 32>}]} {
    %c0 = arith.constant 0 : index
    %c0_0 = arith.constant 0 : index
    %0 = vector.load %arg3[%c0, %c0_0] : memref<1x32xf32, #tpu.memory_space<vmem>>, vector<1x32xf32>
    %c0_1 = arith.constant 0 : index
    %c0_2 = arith.constant 0 : index
    %1 = vector.load %arg4[%c0_1, %c0_2] : memref<1x32xf32, #tpu.memory_space<vmem>>, vector<1x32xf32>
    %c0_3 = arith.constant 0 : index
    %c0_4 = arith.constant 0 : index
    %2 = vector.load %arg10[%c0_3, %c0_4] : memref<1x32xf32, #tpu.memory_space<vmem>>, vector<1x32xf32>
    %c0_5 = arith.constant 0 : index
    %c0_6 = arith.constant 0 : index
    %3 = vector.load %arg11[%c0_5, %c0_6] : memref<1x32xf32, #tpu.memory_space<vmem>>, vector<1x32xf32>
    %c0_7 = arith.constant 0 : index
    %c0_8 = arith.constant 0 : index
    %4 = vector.load %arg9[%c0_7, %c0_8] : memref<1x32xf32, #tpu.memory_space<vmem>>, vector<1x32xf32>
    %c0_9 = arith.constant 0 : index
    %c0_10 = arith.constant 0 : index
    %5 = vector.load %arg13[%c0_9, %c0_10] : memref<1x128xf32, #tpu.memory_space<vmem>>, vector<1x128xf32>
    %c0_11 = arith.constant 0 : index
    %c0_12 = arith.constant 0 : index
    %6 = vector.load %arg15[%c0_11, %c0_12] : memref<1x32xf32, #tpu.memory_space<vmem>>, vector<1x32xf32>
    %c0_13 = arith.constant 0 : index
    %c0_14 = arith.constant 0 : index
    %c0_15 = arith.constant 0 : index
    %7 = vector.load %arg2[%c0_13, %c0_14, %c0_15] : memref<1x8x32xf32, #tpu.memory_space<vmem>>, vector<1x8x32xf32>
    %8 = vector.shape_cast %7 : vector<1x8x32xf32> to vector<8x32xf32>
    %cst = arith.constant dense<0.000000e+00> : vector<8xf32>
    %9 = vector.multi_reduction <add>, %8, %cst [1] : vector<8x32xf32> to vector<8xf32>
    %10 = vector.shape_cast %9 : vector<8xf32> to vector<8x1xf32>
    %cst_16 = arith.constant 3.200000e+01 : f32
    %11 = vector.broadcast %cst_16 : f32 to vector<8x1xf32>
    %12 = arith.divf %10, %11 : vector<8x1xf32>
    %13 = arith.mulf %8, %8 : vector<8x32xf32>
    %cst_17 = arith.constant dense<0.000000e+00> : vector<8xf32>
    %14 = vector.multi_reduction <add>, %13, %cst_17 [1] : vector<8x32xf32> to vector<8xf32>
    %15 = vector.shape_cast %14 : vector<8xf32> to vector<8x1xf32>
    %cst_18 = arith.constant 3.200000e+01 : f32
    %16 = vector.broadcast %cst_18 : f32 to vector<8x1xf32>
    %17 = arith.divf %15, %16 : vector<8x1xf32>
    %18 = arith.mulf %12, %12 : vector<8x1xf32>
    %19 = arith.subf %17, %18 : vector<8x1xf32>
    %20 = vector.broadcast %12 : vector<8x1xf32> to vector<8x32xf32>
    %21 = arith.subf %8, %20 : vector<8x32xf32>
    %cst_19 = arith.constant 9.99999974E-6 : f32
    %22 = vector.broadcast %cst_19 : f32 to vector<8x1xf32>
    %23 = arith.addf %19, %22 : vector<8x1xf32>
    %24 = math.rsqrt %23 : vector<8x1xf32>
    %25 = vector.broadcast %24 : vector<8x1xf32> to vector<8x32xf32>
    %26 = arith.mulf %21, %25 : vector<8x32xf32>
    %27 = vector.broadcast %0 : vector<1x32xf32> to vector<8x32xf32>
    %28 = arith.mulf %26, %27 : vector<8x32xf32>
    %29 = vector.broadcast %1 : vector<1x32xf32> to vector<8x32xf32>
    %30 = arith.addf %28, %29 : vector<8x32xf32>
    %31 = vector.shape_cast %30 : vector<8x32xf32> to vector<1x8x32xf32>
    %32 = vector.shape_cast %31 : vector<1x8x32xf32> to vector<1x8x32xf32>
    %33 = vector.broadcast %32 : vector<1x8x32xf32> to vector<4x8x32xf32>
    %34 = vector.shape_cast %30 : vector<8x32xf32> to vector<1x8x32xf32>
    %35 = vector.shape_cast %34 : vector<1x8x32xf32> to vector<1x8x32xf32>
    %36 = vector.broadcast %35 : vector<1x8x32xf32> to vector<4x8x32xf32>
    %c0_20 = arith.constant 0 : index
    %c0_21 = arith.constant 0 : index
    %c0_22 = arith.constant 0 : index
    %37 = vector.load %arg5[%c0_20, %c0_21, %c0_22] : memref<4x32x8xf32, #tpu.memory_space<vmem>>, vector<4x32x8xf32>
    "tpu.trace_start"() <{level = 10 : i32, message = "hnc,hcd->hnd"}> : () -> ()
    %cst_23 = arith.constant dense<0.000000e+00> : vector<4x8x8xf32>
    %38 = tpu.matmul %36, %37, %cst_23 {dimension_numbers = #tpu.dot_dimension_numbers<[2], [1], [1], [2], [0, 0, 0, 1, 1, 2], [0], [0]>} : vector<4x8x32xf32>, vector<4x32x8xf32>, vector<4x8x8xf32> -> vector<4x8x8xf32>
    "tpu.trace_stop"() : () -> ()
    %c0_24 = arith.constant 0 : index
    %c0_25 = arith.constant 0 : index
    %c0_26 = arith.constant 0 : index
    %39 = vector.load %arg6[%c0_24, %c0_25, %c0_26] : memref<4x32x8xf32, #tpu.memory_space<vmem>>, vector<4x32x8xf32>
    "tpu.trace_start"() <{level = 10 : i32, message = "hmc,hcd->hmd"}> : () -> ()
    %cst_27 = arith.constant dense<0.000000e+00> : vector<4x8x8xf32>
    %40 = tpu.matmul %33, %39, %cst_27 {dimension_numbers = #tpu.dot_dimension_numbers<[2], [1], [1], [2], [0, 0, 0, 1, 1, 2], [0], [0]>} : vector<4x8x32xf32>, vector<4x32x8xf32>, vector<4x8x8xf32> -> vector<4x8x8xf32>
    "tpu.trace_stop"() : () -> ()
    %c0_28 = arith.constant 0 : index
    %c0_29 = arith.constant 0 : index
    %c0_30 = arith.constant 0 : index
    %41 = vector.load %arg7[%c0_28, %c0_29, %c0_30] : memref<4x32x8xf32, #tpu.memory_space<vmem>>, vector<4x32x8xf32>
    "tpu.trace_start"() <{level = 10 : i32, message = "hmc,hcd->hmd"}> : () -> ()
    %cst_31 = arith.constant dense<0.000000e+00> : vector<4x8x8xf32>
    %42 = tpu.matmul %33, %41, %cst_31 {dimension_numbers = #tpu.dot_dimension_numbers<[2], [1], [1], [2], [0, 0, 0, 1, 1, 2], [0], [0]>} : vector<4x8x32xf32>, vector<4x32x8xf32>, vector<4x8x8xf32> -> vector<4x8x8xf32>
    "tpu.trace_stop"() : () -> ()
    "tpu.trace_start"() <{level = 10 : i32, message = "hnd,hmd->hnm"}> : () -> ()
    %cst_32 = arith.constant dense<0.000000e+00> : vector<4x8x8xf32>
    %43 = tpu.matmul %38, %40, %cst_32 {dimension_numbers = #tpu.dot_dimension_numbers<[2], [2], [1], [1], [0, 0, 0, 1, 1, 1], [0], [0]>} : vector<4x8x8xf32>, vector<4x8x8xf32>, vector<4x8x8xf32> -> vector<4x8x8xf32>
    "tpu.trace_stop"() : () -> ()
    %cst_33 = arith.constant dense<0xFF800000> : vector<4x8xf32>
    %44 = vector.multi_reduction <maximumf>, %43, %cst_33 [2] : vector<4x8x8xf32> to vector<4x8xf32>
    %45 = vector.shape_cast %44 : vector<4x8xf32> to vector<4x8x1xf32>
    %46 = vector.broadcast %45 : vector<4x8x1xf32> to vector<4x8x8xf32>
    %47 = arith.subf %43, %46 : vector<4x8x8xf32>
    %48 = math.exp %47 : vector<4x8x8xf32>
    %cst_34 = arith.constant dense<0.000000e+00> : vector<4x8xf32>
    %49 = vector.multi_reduction <add>, %48, %cst_34 [2] : vector<4x8x8xf32> to vector<4x8xf32>
    %50 = vector.shape_cast %49 : vector<4x8xf32> to vector<4x8x1xf32>
    %51 = tpu.reciprocal %50 : vector<4x8x1xf32> -> vector<4x8x1xf32>
    %52 = vector.broadcast %51 : vector<4x8x1xf32> to vector<4x8x8xf32>
    %53 = arith.mulf %48, %52 : vector<4x8x8xf32>
    "tpu.trace_start"() <{level = 10 : i32, message = "hnm,hmd->hnd"}> : () -> ()
    %cst_35 = arith.constant dense<0.000000e+00> : vector<4x8x8xf32>
    %54 = tpu.matmul %53, %42, %cst_35 {dimension_numbers = #tpu.dot_dimension_numbers<[2], [1], [1], [2], [0, 0, 0, 1, 1, 2], [0], [0]>} : vector<4x8x8xf32>, vector<4x8x8xf32>, vector<4x8x8xf32> -> vector<4x8x8xf32>
    "tpu.trace_stop"() : () -> ()
    %c0_36 = arith.constant 0 : index
    %c0_37 = arith.constant 0 : index
    %c0_38 = arith.constant 0 : index
    %55 = vector.load %arg8[%c0_36, %c0_37, %c0_38] : memref<4x8x32xf32, #tpu.memory_space<vmem>>, vector<4x8x32xf32>
    "tpu.trace_start"() <{level = 10 : i32, message = "hnd,hdc->hnc"}> : () -> ()
    %cst_39 = arith.constant dense<0.000000e+00> : vector<4x8x32xf32>
    %56 = tpu.matmul %54, %55, %cst_39 {dimension_numbers = #tpu.dot_dimension_numbers<[2], [1], [1], [2], [0, 0, 0, 1, 1, 2], [0], [0]>} : vector<4x8x8xf32>, vector<4x8x32xf32>, vector<4x8x32xf32> -> vector<4x8x32xf32>
    "tpu.trace_stop"() : () -> ()
    %cst_40 = arith.constant dense<0.000000e+00> : vector<8x32xf32>
    %57 = vector.multi_reduction <add>, %56, %cst_40 [0] : vector<4x8x32xf32> to vector<8x32xf32>
    %58 = vector.broadcast %4 : vector<1x32xf32> to vector<8x32xf32>
    %59 = arith.addf %57, %58 : vector<8x32xf32>
    %60 = arith.addf %8, %59 : vector<8x32xf32>
    %cst_41 = arith.constant dense<0.000000e+00> : vector<8xf32>
    %61 = vector.multi_reduction <add>, %60, %cst_41 [1] : vector<8x32xf32> to vector<8xf32>
    %62 = vector.shape_cast %61 : vector<8xf32> to vector<8x1xf32>
    %cst_42 = arith.constant 3.200000e+01 : f32
    %63 = vector.broadcast %cst_42 : f32 to vector<8x1xf32>
    %64 = arith.divf %62, %63 : vector<8x1xf32>
    %65 = arith.mulf %60, %60 : vector<8x32xf32>
    %cst_43 = arith.constant dense<0.000000e+00> : vector<8xf32>
    %66 = vector.multi_reduction <add>, %65, %cst_43 [1] : vector<8x32xf32> to vector<8xf32>
    %67 = vector.shape_cast %66 : vector<8xf32> to vector<8x1xf32>
    %cst_44 = arith.constant 3.200000e+01 : f32
    %68 = vector.broadcast %cst_44 : f32 to vector<8x1xf32>
    %69 = arith.divf %67, %68 : vector<8x1xf32>
    %70 = arith.mulf %64, %64 : vector<8x1xf32>
    %71 = arith.subf %69, %70 : vector<8x1xf32>
    %72 = vector.broadcast %64 : vector<8x1xf32> to vector<8x32xf32>
    %73 = arith.subf %60, %72 : vector<8x32xf32>
    %cst_45 = arith.constant 9.99999974E-6 : f32
    %74 = vector.broadcast %cst_45 : f32 to vector<8x1xf32>
    %75 = arith.addf %71, %74 : vector<8x1xf32>
    %76 = math.rsqrt %75 : vector<8x1xf32>
    %77 = vector.broadcast %76 : vector<8x1xf32> to vector<8x32xf32>
    %78 = arith.mulf %73, %77 : vector<8x32xf32>
    %79 = vector.broadcast %2 : vector<1x32xf32> to vector<8x32xf32>
    %80 = arith.mulf %78, %79 : vector<8x32xf32>
    %81 = vector.broadcast %3 : vector<1x32xf32> to vector<8x32xf32>
    %82 = arith.addf %80, %81 : vector<8x32xf32>
    %c0_46 = arith.constant 0 : index
    %c0_47 = arith.constant 0 : index
    %83 = vector.load %arg12[%c0_46, %c0_47] : memref<32x128xf32, #tpu.memory_space<vmem>>, vector<32x128xf32>
    %cst_48 = arith.constant dense<0.000000e+00> : vector<8x128xf32>
    %84 = tpu.matmul %82, %83, %cst_48 {dimension_numbers = #tpu.dot_dimension_numbers<[1], [0], [0], [1], [0, 0, 1, 1], [], []>} : vector<8x32xf32>, vector<32x128xf32>, vector<8x128xf32> -> vector<8x128xf32>
    %85 = vector.broadcast %5 : vector<1x128xf32> to vector<8x128xf32>
    %86 = arith.addf %84, %85 : vector<8x128xf32>
    %cst_49 = arith.constant 5.000000e-01 : f32
    %87 = vector.broadcast %cst_49 : f32 to vector<8x128xf32>
    %88 = arith.mulf %87, %86 : vector<8x128xf32>
    %cst_50 = arith.constant 0.707106769 : f32
    %89 = vector.broadcast %cst_50 : f32 to vector<8x128xf32>
    %90 = arith.mulf %86, %89 : vector<8x128xf32>
    %91 = math.erf %90 : vector<8x128xf32>
    %cst_51 = arith.constant 1.000000e+00 : f32
    %92 = vector.broadcast %cst_51 : f32 to vector<8x128xf32>
    %93 = arith.addf %92, %91 : vector<8x128xf32>
    %94 = arith.mulf %88, %93 : vector<8x128xf32>
    %c0_52 = arith.constant 0 : index
    %c0_53 = arith.constant 0 : index
    %95 = vector.load %arg14[%c0_52, %c0_53] : memref<128x32xf32, #tpu.memory_space<vmem>>, vector<128x32xf32>
    %cst_54 = arith.constant dense<0.000000e+00> : vector<8x32xf32>
    %96 = tpu.matmul %94, %95, %cst_54 {dimension_numbers = #tpu.dot_dimension_numbers<[1], [0], [0], [1], [0, 0, 1, 1], [], []>} : vector<8x128xf32>, vector<128x32xf32>, vector<8x32xf32> -> vector<8x32xf32>
    %97 = vector.broadcast %6 : vector<1x32xf32> to vector<8x32xf32>
    %98 = arith.addf %96, %97 : vector<8x32xf32>
    %99 = arith.addf %60, %98 : vector<8x32xf32>
    %c0_55 = arith.constant 0 : index
    %c0_56 = arith.constant 0 : index
    %c0_57 = arith.constant 0 : index
    %100 = vector.load %arg16[%c0_55, %c0_56, %c0_57] : memref<1x8x32xf32, #tpu.memory_space<vmem>>, vector<1x8x32xf32>
    %101 = vector.shape_cast %100 : vector<1x8x32xf32> to vector<8x32xf32>
    %102 = vector.shape_cast %99 : vector<8x32xf32> to vector<1x8x32xf32>
    tpu.vector_store %arg16[%c0_55, %c0_56, %c0_57], %102 {strides = array<i32>} : memref<1x8x32xf32, #tpu.memory_space<vmem>>, vector<1x8x32xf32>,
    return
  }
  func.func @transform_0(%arg0: i32, %arg1: i32) -> (i32, i32, i32) {
    %c0_i32 = arith.constant 0 : i32
    %c0_i32_0 = arith.constant 0 : i32
    %c0_i32_1 = arith.constant 0 : i32
    return %arg0, %c0_i32, %c0_i32_0 : i32, i32, i32
  }
  func.func @transform_1(%arg0: i32, %arg1: i32) -> (i32, i32) {
    %c0_i32 = arith.constant 0 : i32
    %c0_i32_0 = arith.constant 0 : i32
    %c0_i32_1 = arith.constant 0 : i32
    return %c0_i32, %c0_i32_0 : i32, i32
  }
  func.func @transform_2(%arg0: i32, %arg1: i32) -> (i32, i32) {
    %c0_i32 = arith.constant 0 : i32
    %c0_i32_0 = arith.constant 0 : i32
    %c0_i32_1 = arith.constant 0 : i32
    return %c0_i32, %c0_i32_0 : i32, i32
  }
  func.func @transform_3(%arg0: i32, %arg1: i32) -> (i32, i32, i32) {
    %c0_i32 = arith.constant 0 : i32
    %c0_i32_0 = arith.constant 0 : i32
    %c0_i32_1 = arith.constant 0 : i32
    %c0_i32_2 = arith.constant 0 : i32
    return %c0_i32, %c0_i32_0, %c0_i32_1 : i32, i32, i32
  }
  func.func @transform_4(%arg0: i32, %arg1: i32) -> (i32, i32, i32) {
    %c0_i32 = arith.constant 0 : i32
    %c0_i32_0 = arith.constant 0 : i32
    %c0_i32_1 = arith.constant 0 : i32
    %c0_i32_2 = arith.constant 0 : i32
    return %c0_i32, %c0_i32_0, %c0_i32_1 : i32, i32, i32
  }
  func.func @transform_5(%arg0: i32, %arg1: i32) -> (i32, i32, i32) {
    %c0_i32 = arith.constant 0 : i32
    %c0_i32_0 = arith.constant 0 : i32
    %c0_i32_1 = arith.constant 0 : i32
    %c0_i32_2 = arith.constant 0 : i32
    return %c0_i32, %c0_i32_0, %c0_i32_1 : i32, i32, i32
  }
  func.func @transform_6(%arg0: i32, %arg1: i32) -> (i32, i32, i32) {
    %c0_i32 = arith.constant 0 : i32
    %c0_i32_0 = arith.constant 0 : i32
    %c0_i32_1 = arith.constant 0 : i32
    %c0_i32_2 = arith.constant 0 : i32
    return %c0_i32, %c0_i32_0, %c0_i32_1 : i32, i32, i32
  }
  func.func @transform_7(%arg0: i32, %arg1: i32) -> (i32, i32) {
    %c0_i32 = arith.constant 0 : i32
    %c0_i32_0 = arith.constant 0 : i32
    %c0_i32_1 = arith.constant 0 : i32
    return %c0_i32, %c0_i32_0 : i32, i32
  }
  func.func @transform_8(%arg0: i32, %arg1: i32) -> (i32, i32) {
    %c0_i32 = arith.constant 0 : i32
    %c0_i32_0 = arith.constant 0 : i32
    %c0_i32_1 = arith.constant 0 : i32
    return %c0_i32, %c0_i32_0 : i32, i32
  }
  func.func @transform_9(%arg0: i32, %arg1: i32) -> (i32, i32) {
    %c0_i32 = arith.constant 0 : i32
    %c0_i32_0 = arith.constant 0 : i32
    %c0_i32_1 = arith.constant 0 : i32
    return %c0_i32, %c0_i32_0 : i32, i32
  }
  func.func @transform_10(%arg0: i32, %arg1: i32) -> (i32, i32) {
    %c0_i32 = arith.constant 0 : i32
    %c0_i32_0 = arith.constant 0 : i32
    %c0_i32_1 = arith.constant 0 : i32
    return %c0_i32, %c0_i32_0 : i32, i32
  }
  func.func @transform_11(%arg0: i32, %arg1: i32) -> (i32, i32) {
    %c0_i32 = arith.constant 0 : i32
    %c0_i32_0 = arith.constant 0 : i32
    %c0_i32_1 = arith.constant 0 : i32
    return %c0_i32, %c0_i32_0 : i32, i32
  }
  func.func @transform_12(%arg0: i32, %arg1: i32) -> (i32, i32) {
    %c0_i32 = arith.constant 0 : i32
    %c0_i32_0 = arith.constant 0 : i32
    %c0_i32_1 = arith.constant 0 : i32
    return %c0_i32, %c0_i32_0 : i32, i32
  }
  func.func @transform_13(%arg0: i32, %arg1: i32) -> (i32, i32) {
    %c0_i32 = arith.constant 0 : i32
    %c0_i32_0 = arith.constant 0 : i32
    %c0_i32_1 = arith.constant 0 : i32
    return %c0_i32, %c0_i32_0 : i32, i32
  }
  func.func @transform_14(%arg0: i32, %arg1: i32) -> (i32, i32, i32) {
    %c0_i32 = arith.constant 0 : i32
    %c0_i32_0 = arith.constant 0 : i32
    return %arg0, %arg1, %c0_i32 : i32, i32, i32
  }
}

module attributes {stable_mosaic.version = 11 : i64} {
  func.func @block_kernel(%arg0: i32, %arg1: i32, %arg2: memref<1x8x32xf32, #tpu.memory_space<vmem>>, %arg3: memref<1x32xf32, #tpu.memory_space<vmem>>, %arg4: memref<1x32xf32, #tpu.memory_space<vmem>>, %arg5: memref<4x32x8xf32, #tpu.memory_space<vmem>>, %arg6: memref<4x32x8xf32, #tpu.memory_space<vmem>>, %arg7: memref<4x32x8xf32, #tpu.memory_space<vmem>>, %arg8: memref<4x8x32xf32, #tpu.memory_space<vmem>>, %arg9: memref<1x32xf32, #tpu.memory_space<vmem>>, %arg10: memref<1x32xf32, #tpu.memory_space<vmem>>, %arg11: memref<1x32xf32, #tpu.memory_space<vmem>>, %arg12: memref<32x128xf32, #tpu.memory_space<vmem>>, %arg13: memref<1x128xf32, #tpu.memory_space<vmem>>, %arg14: memref<128x32xf32, #tpu.memory_space<vmem>>, %arg15: memref<1x32xf32, #tpu.memory_space<vmem>>, %arg16: memref<1x8x32xf32, #tpu.memory_space<vmem>>) attributes {dimension_semantics = [#tpu.dimension_semantics<parallel>, #tpu.dimension_semantics<parallel>], iteration_bounds = array<i64: 2, 1>, scalar_prefetch = 0 : i64, scratch_operands = 0 : i64, tpu.core_type = #tpu.core_type<tc>, window_params = [{transform_indices = @transform_0, window_bounds = array<i64: 1, 8, 32>}, {pipeline_mode = #tpu.pipeline_mode<synchronous>, transform_indices = @transform_1, window_bounds = array<i64: 1, 32>}, {pipeline_mode = #tpu.pipeline_mode<synchronous>, transform_indices = @transform_2, window_bounds = array<i64: 1, 32>}, {pipeline_mode = #tpu.pipeline_mode<synchronous>, transform_indices = @transform_3, window_bounds = array<i64: 4, 32, 8>}, {pipeline_mode = #tpu.pipeline_mode<synchronous>, transform_indices = @transform_4, window_bounds = array<i64: 4, 32, 8>}, {pipeline_mode = #tpu.pipeline_mode<synchronous>, transform_indices = @transform_5, window_bounds = array<i64: 4, 32, 8>}, {pipeline_mode = #tpu.pipeline_mode<synchronous>, transform_indices = @transform_6, window_bounds = array<i64: 4, 8, 32>}, {pipeline_mode = #tpu.pipeline_mode<synchronous>, transform_indices = @transform_7, window_bounds = array<i64: 1, 32>}, {pipeline_mode = #tpu.pipeline_mode<synchronous>, transform_indices = @transform_8, window_bounds = array<i64: 1, 32>}, {pipeline_mode = #tpu.pipeline_mode<synchronous>, transform_indices = @transform_9, window_bounds = array<i64: 1, 32>}, {pipeline_mode = #tpu.pipeline_mode<synchronous>, transform_indices = @transform_10, window_bounds = array<i64: 32, 128>}, {pipeline_mode = #tpu.pipeline_mode<synchronous>, transform_indices = @transform_11, window_bounds = array<i64: 1, 128>}, {pipeline_mode = #tpu.pipeline_mode<synchronous>, transform_indices = @transform_12, window_bounds = array<i64: 128, 32>}, {pipeline_mode = #tpu.pipeline_mode<synchronous>, transform_indices = @transform_13, window_bounds = array<i64: 1, 32>}, {transform_indices = @transform_14, window_bounds = array<i64: 1, 8, 32>}]} {
    %c0 = arith.constant 0 : index
    %c0_0 = arith.constant 0 : index
    %0 = vector.load %arg3[%c0, %c0_0] : memref<1x32xf32, #tpu.memory_space<vmem>>, vector<1x32xf32>
    %c0_1 = arith.constant 0 : index
    %c0_2 = arith.constant 0 : index
    %1 = vector.load %arg4[%c0_1, %c0_2] : memref<1x32xf32, #tpu.memory_space<vmem>>, vector<1x32xf32>
    %c0_3 = arith.constant 0 : index
    %c0_4 = arith.constant 0 : index
    %2 = vector.load %arg10[%c0_3, %c0_4] : memref<1x32xf32, #tpu.memory_space<vmem>>, vector<1x32xf32>
    %c0_5 = arith.constant 0 : index
    %c0_6 = arith.constant 0 : index
    %3 = vector.load %arg11[%c0_5, %c0_6] : memref<1x32xf32, #tpu.memory_space<vmem>>, vector<1x32xf32>
    %c0_7 = arith.constant 0 : index
    %c0_8 = arith.constant 0 : index
    %4 = vector.load %arg9[%c0_7, %c0_8] : memref<1x32xf32, #tpu.memory_space<vmem>>, vector<1x32xf32>
    %c0_9 = arith.constant 0 : index
    %c0_10 = arith.constant 0 : index
    %5 = vector.load %arg13[%c0_9, %c0_10] : memref<1x128xf32, #tpu.memory_space<vmem>>, vector<1x128xf32>
    %c0_11 = arith.constant 0 : index
    %c0_12 = arith.constant 0 : index
    %6 = vector.load %arg15[%c0_11, %c0_12] : memref<1x32xf32, #tpu.memory_space<vmem>>, vector<1x32xf32>
    %c0_13 = arith.constant 0 : index
    %c0_14 = arith.constant 0 : index
    %c0_15 = arith.constant 0 : index
    %7 = vector.load %arg2[%c0_13, %c0_14, %c0_15] : memref<1x8x32xf32, #tpu.memory_space<vmem>>, vector<1x8x32xf32>
    %8 = vector.shape_cast %7 : vector<1x8x32xf32> to vector<8x32xf32>
    %cst = arith.constant dense<0.000000e+00> : vector<8xf32>
    %9 = vector.multi_reduction <add>, %8, %cst [1] : vector<8x32xf32> to vector<8xf32>
    %10 = vector.shape_cast %9 : vector<8xf32> to vector<8x1xf32>
    %cst_16 = arith.constant 3.200000e+01 : f32
    %11 = vector.broadcast %cst_16 : f32 to vector<8x1xf32>
    %12 = arith.divf %10, %11 : vector<8x1xf32>
    %13 = arith.mulf %8, %8 : vector<8x32xf32>
    %cst_17 = arith.constant dense<0.000000e+00> : vector<8xf32>
    %14 = vector.multi_reduction <add>, %13, %cst_17 [1] : vector<8x32xf32> to vector<8xf32>
    %15 = vector.shape_cast %14 : vector<8xf32> to vector<8x1xf32>
    %cst_18 = arith.constant 3.200000e+01 : f32
    %16 = vector.broadcast %cst_18 : f32 to vector<8x1xf32>
    %17 = arith.divf %15, %16 : vector<8x1xf32>
    %18 = arith.mulf %12, %12 : vector<8x1xf32>
    %19 = arith.subf %17, %18 : vector<8x1xf32>
    %20 = vector.broadcast %12 : vector<8x1xf32> to vector<8x32xf32>
    %21 = arith.subf %8, %20 : vector<8x32xf32>
    %cst_19 = arith.constant 9.99999974E-6 : f32
    %22 = vector.broadcast %cst_19 : f32 to vector<8x1xf32>
    %23 = arith.addf %19, %22 : vector<8x1xf32>
    %24 = math.rsqrt %23 : vector<8x1xf32>
    %25 = vector.broadcast %24 : vector<8x1xf32> to vector<8x32xf32>
    %26 = arith.mulf %21, %25 : vector<8x32xf32>
    %27 = vector.broadcast %0 : vector<1x32xf32> to vector<8x32xf32>
    %28 = arith.mulf %26, %27 : vector<8x32xf32>
    %29 = vector.broadcast %1 : vector<1x32xf32> to vector<8x32xf32>
    %30 = arith.addf %28, %29 : vector<8x32xf32>
    %31 = vector.shape_cast %30 : vector<8x32xf32> to vector<1x8x32xf32>
    %32 = vector.shape_cast %31 : vector<1x8x32xf32> to vector<1x8x32xf32>
    %33 = vector.broadcast %32 : vector<1x8x32xf32> to vector<4x8x32xf32>
    %34 = vector.shape_cast %30 : vector<8x32xf32> to vector<1x8x32xf32>
    %35 = vector.shape_cast %34 : vector<1x8x32xf32> to vector<1x8x32xf32>
    %36 = vector.broadcast %35 : vector<1x8x32xf32> to vector<4x8x32xf32>
    %c0_20 = arith.constant 0 : index
    %c0_21 = arith.constant 0 : index
    %c0_22 = arith.constant 0 : index
    %37 = vector.load %arg5[%c0_20, %c0_21, %c0_22] : memref<4x32x8xf32, #tpu.memory_space<vmem>>, vector<4x32x8xf32>
    "tpu.trace_start"() <{level = 10 : i32, message = "hnc,hcd->hnd"}> : () -> ()
    %cst_23 = arith.constant dense<0.000000e+00> : vector<4x8x8xf32>
    %38 = tpu.matmul %36, %37, %cst_23 {dimension_numbers = #tpu.dot_dimension_numbers<[2], [1], [1], [2], [0, 0, 0, 1, 1, 2], [0], [0]>} : vector<4x8x32xf32>, vector<4x32x8xf32>, vector<4x8x8xf32> -> vector<4x8x8xf32>
    "tpu.trace_stop"() : () -> ()
    %c0_24 = arith.constant 0 : index
    %c0_25 = arith.constant 0 : index
    %c0_26 = arith.constant 0 : index
    %39 = vector.load %arg6[%c0_24, %c0_25, %c0_26] : memref<4x32x8xf32, #tpu.memory_space<vmem>>, vector<4x32x8xf32>
    "tpu.trace_start"() <{level = 10 : i32, message = "hmc,hcd->hmd"}> : () -> ()
    %cst_27 = arith.constant dense<0.000000e+00> : vector<4x8x8xf32>
    %40 = tpu.matmul %33, %39, %cst_27 {dimension_numbers = #tpu.dot_dimension_numbers<[2], [1], [1], [2], [0, 0, 0, 1, 1, 2], [0], [0]>} : vector<4x8x32xf32>, vector<4x32x8xf32>, vector<4x8x8xf32> -> vector<4x8x8xf32>
    "tpu.trace_stop"() : () -> ()
    %c0_28 = arith.constant 0 : index
    %c0_29 = arith.constant 0 : index
    %c0_30 = arith.constant 0 : index
    %41 = vector.load %arg7[%c0_28, %c0_29, %c0_30] : memref<4x32x8xf32, #tpu.memory_space<vmem>>, vector<4x32x8xf32>
    "tpu.trace_start"() <{level = 10 : i32, message = "hmc,hcd->hmd"}> : () -> ()
    %cst_31 = arith.constant dense<0.000000e+00> : vector<4x8x8xf32>
    %42 = tpu.matmul %33, %41, %cst_31 {dimension_numbers = #tpu.dot_dimension_numbers<[2], [1], [1], [2], [0, 0, 0, 1, 1, 2], [0], [0]>} : vector<4x8x32xf32>, vector<4x32x8xf32>, vector<4x8x8xf32> -> vector<4x8x8xf32>
    "tpu.trace_stop"() : () -> ()
    "tpu.trace_start"() <{level = 10 : i32, message = "hnd,hmd->hnm"}> : () -> ()
    %cst_32 = arith.constant dense<0.000000e+00> : vector<4x8x8xf32>
    %43 = tpu.matmul %38, %40, %cst_32 {dimension_numbers = #tpu.dot_dimension_numbers<[2], [2], [1], [1], [0, 0, 0, 1, 1, 1], [0], [0]>} : vector<4x8x8xf32>, vector<4x8x8xf32>, vector<4x8x8xf32> -> vector<4x8x8xf32>
    "tpu.trace_stop"() : () -> ()
    %cst_33 = arith.constant dense<0xFF800000> : vector<4x8xf32>
    %44 = vector.multi_reduction <maximumf>, %43, %cst_33 [2] : vector<4x8x8xf32> to vector<4x8xf32>
    %45 = vector.shape_cast %44 : vector<4x8xf32> to vector<4x8x1xf32>
    %46 = vector.broadcast %45 : vector<4x8x1xf32> to vector<4x8x8xf32>
    %47 = arith.subf %43, %46 : vector<4x8x8xf32>
    %48 = math.exp %47 : vector<4x8x8xf32>
    %cst_34 = arith.constant dense<0.000000e+00> : vector<4x8xf32>
    %49 = vector.multi_reduction <add>, %48, %cst_34 [2] : vector<4x8x8xf32> to vector<4x8xf32>
    %50 = vector.shape_cast %49 : vector<4x8xf32> to vector<4x8x1xf32>
    %51 = tpu.reciprocal %50 : vector<4x8x1xf32> -> vector<4x8x1xf32>
    %52 = vector.broadcast %51 : vector<4x8x1xf32> to vector<4x8x8xf32>
    %53 = arith.mulf %48, %52 : vector<4x8x8xf32>
    "tpu.trace_start"() <{level = 10 : i32, message = "hnm,hmd->hnd"}> : () -> ()
    %cst_35 = arith.constant dense<0.000000e+00> : vector<4x8x8xf32>
    %54 = tpu.matmul %53, %42, %cst_35 {dimension_numbers = #tpu.dot_dimension_numbers<[2], [1], [1], [2], [0, 0, 0, 1, 1, 2], [0], [0]>} : vector<4x8x8xf32>, vector<4x8x8xf32>, vector<4x8x8xf32> -> vector<4x8x8xf32>
    "tpu.trace_stop"() : () -> ()
    %c0_36 = arith.constant 0 : index
    %c0_37 = arith.constant 0 : index
    %c0_38 = arith.constant 0 : index
    %55 = vector.load %arg8[%c0_36, %c0_37, %c0_38] : memref<4x8x32xf32, #tpu.memory_space<vmem>>, vector<4x8x32xf32>
    "tpu.trace_start"() <{level = 10 : i32, message = "hnd,hdc->hnc"}> : () -> ()
    %cst_39 = arith.constant dense<0.000000e+00> : vector<4x8x32xf32>
    %56 = tpu.matmul %54, %55, %cst_39 {dimension_numbers = #tpu.dot_dimension_numbers<[2], [1], [1], [2], [0, 0, 0, 1, 1, 2], [0], [0]>} : vector<4x8x8xf32>, vector<4x8x32xf32>, vector<4x8x32xf32> -> vector<4x8x32xf32>
    "tpu.trace_stop"() : () -> ()
    %cst_40 = arith.constant dense<0.000000e+00> : vector<8x32xf32>
    %57 = vector.multi_reduction <add>, %56, %cst_40 [0] : vector<4x8x32xf32> to vector<8x32xf32>
    %58 = vector.broadcast %4 : vector<1x32xf32> to vector<8x32xf32>
    %59 = arith.addf %57, %58 : vector<8x32xf32>
    %60 = arith.addf %8, %59 : vector<8x32xf32>
    %cst_41 = arith.constant dense<0.000000e+00> : vector<8xf32>
    %61 = vector.multi_reduction <add>, %60, %cst_41 [1] : vector<8x32xf32> to vector<8xf32>
    %62 = vector.shape_cast %61 : vector<8xf32> to vector<8x1xf32>
    %cst_42 = arith.constant 3.200000e+01 : f32
    %63 = vector.broadcast %cst_42 : f32 to vector<8x1xf32>
    %64 = arith.divf %62, %63 : vector<8x1xf32>
    %65 = arith.mulf %60, %60 : vector<8x32xf32>
    %cst_43 = arith.constant dense<0.000000e+00> : vector<8xf32>
    %66 = vector.multi_reduction <add>, %65, %cst_43 [1] : vector<8x32xf32> to vector<8xf32>
    %67 = vector.shape_cast %66 : vector<8xf32> to vector<8x1xf32>
    %cst_44 = arith.constant 3.200000e+01 : f32
    %68 = vector.broadcast %cst_44 : f32 to vector<8x1xf32>
    %69 = arith.divf %67, %68 : vector<8x1xf32>
    %70 = arith.mulf %64, %64 : vector<8x1xf32>
    %71 = arith.subf %69, %70 : vector<8x1xf32>
    %72 = vector.broadcast %64 : vector<8x1xf32> to vector<8x32xf32>
    %73 = arith.subf %60, %72 : vector<8x32xf32>
    %cst_45 = arith.constant 9.99999974E-6 : f32
    %74 = vector.broadcast %cst_45 : f32 to vector<8x1xf32>
    %75 = arith.addf %71, %74 : vector<8x1xf32>
    %76 = math.rsqrt %75 : vector<8x1xf32>
    %77 = vector.broadcast %76 : vector<8x1xf32> to vector<8x32xf32>
    %78 = arith.mulf %73, %77 : vector<8x32xf32>
    %79 = vector.broadcast %2 : vector<1x32xf32> to vector<8x32xf32>
    %80 = arith.mulf %78, %79 : vector<8x32xf32>
    %81 = vector.broadcast %3 : vector<1x32xf32> to vector<8x32xf32>
    %82 = arith.addf %80, %81 : vector<8x32xf32>
    %c0_46 = arith.constant 0 : index
    %c0_47 = arith.constant 0 : index
    %83 = vector.load %arg12[%c0_46, %c0_47] : memref<32x128xf32, #tpu.memory_space<vmem>>, vector<32x128xf32>
    %cst_48 = arith.constant dense<0.000000e+00> : vector<8x128xf32>
    %84 = tpu.matmul %82, %83, %cst_48 {dimension_numbers = #tpu.dot_dimension_numbers<[1], [0], [0], [1], [0, 0, 1, 1], [], []>} : vector<8x32xf32>, vector<32x128xf32>, vector<8x128xf32> -> vector<8x128xf32>
    %85 = vector.broadcast %5 : vector<1x128xf32> to vector<8x128xf32>
    %86 = arith.addf %84, %85 : vector<8x128xf32>
    %87 = arith.mulf %86, %86 : vector<8x128xf32>
    %88 = arith.mulf %86, %87 : vector<8x128xf32>
    %cst_49 = arith.constant 4.471500e-02 : f32
    %89 = vector.broadcast %cst_49 : f32 to vector<8x128xf32>
    %90 = arith.mulf %89, %88 : vector<8x128xf32>
    %91 = arith.addf %86, %90 : vector<8x128xf32>
    %cst_50 = arith.constant 0.797884583 : f32
    %92 = vector.broadcast %cst_50 : f32 to vector<8x128xf32>
    %93 = arith.mulf %92, %91 : vector<8x128xf32>
    %94 = math.tanh %93 : vector<8x128xf32>
    %cst_51 = arith.constant 1.000000e+00 : f32
    %95 = vector.broadcast %cst_51 : f32 to vector<8x128xf32>
    %96 = arith.addf %95, %94 : vector<8x128xf32>
    %cst_52 = arith.constant 5.000000e-01 : f32
    %97 = vector.broadcast %cst_52 : f32 to vector<8x128xf32>
    %98 = arith.mulf %97, %96 : vector<8x128xf32>
    %99 = arith.mulf %86, %98 : vector<8x128xf32>
    %c0_53 = arith.constant 0 : index
    %c0_54 = arith.constant 0 : index
    %100 = vector.load %arg14[%c0_53, %c0_54] : memref<128x32xf32, #tpu.memory_space<vmem>>, vector<128x32xf32>
    %cst_55 = arith.constant dense<0.000000e+00> : vector<8x32xf32>
    %101 = tpu.matmul %99, %100, %cst_55 {dimension_numbers = #tpu.dot_dimension_numbers<[1], [0], [0], [1], [0, 0, 1, 1], [], []>} : vector<8x128xf32>, vector<128x32xf32>, vector<8x32xf32> -> vector<8x32xf32>
    %102 = vector.broadcast %6 : vector<1x32xf32> to vector<8x32xf32>
    %103 = arith.addf %101, %102 : vector<8x32xf32>
    %104 = arith.addf %60, %103 : vector<8x32xf32>
    %c0_56 = arith.constant 0 : index
    %c0_57 = arith.constant 0 : index
    %c0_58 = arith.constant 0 : index
    %105 = vector.load %arg16[%c0_56, %c0_57, %c0_58] : memref<1x8x32xf32, #tpu.memory_space<vmem>>, vector<1x8x32xf32>
    %106 = vector.shape_cast %105 : vector<1x8x32xf32> to vector<8x32xf32>
    %107 = vector.shape_cast %104 : vector<8x32xf32> to vector<1x8x32xf32>
    tpu.vector_store %arg16[%c0_56, %c0_57, %c0_58], %107 {strides = array<i32>} : memref<1x8x32xf32, #tpu.memory_space<vmem>>, vector<1x8x32xf32>,
    return
  }
  func.func @transform_0(%arg0: i32, %arg1: i32) -> (i32, i32, i32) {
    %c0_i32 = arith.constant 0 : i32
    %c0_i32_0 = arith.constant 0 : i32
    %c0_i32_1 = arith.constant 0 : i32
    return %arg0, %c0_i32, %c0_i32_0 : i32, i32, i32
  }
  func.func @transform_1(%arg0: i32, %arg1: i32) -> (i32, i32) {
    %c0_i32 = arith.constant 0 : i32
    %c0_i32_0 = arith.constant 0 : i32
    %c0_i32_1 = arith.constant 0 : i32
    return %c0_i32, %c0_i32_0 : i32, i32
  }
  func.func @transform_2(%arg0: i32, %arg1: i32) -> (i32, i32) {
    %c0_i32 = arith.constant 0 : i32
    %c0_i32_0 = arith.constant 0 : i32
    %c0_i32_1 = arith.constant 0 : i32
    return %c0_i32, %c0_i32_0 : i32, i32
  }
  func.func @transform_3(%arg0: i32, %arg1: i32) -> (i32, i32, i32) {
    %c0_i32 = arith.constant 0 : i32
    %c0_i32_0 = arith.constant 0 : i32
    %c0_i32_1 = arith.constant 0 : i32
    %c0_i32_2 = arith.constant 0 : i32
    return %c0_i32, %c0_i32_0, %c0_i32_1 : i32, i32, i32
  }
  func.func @transform_4(%arg0: i32, %arg1: i32) -> (i32, i32, i32) {
    %c0_i32 = arith.constant 0 : i32
    %c0_i32_0 = arith.constant 0 : i32
    %c0_i32_1 = arith.constant 0 : i32
    %c0_i32_2 = arith.constant 0 : i32
    return %c0_i32, %c0_i32_0, %c0_i32_1 : i32, i32, i32
  }
  func.func @transform_5(%arg0: i32, %arg1: i32) -> (i32, i32, i32) {
    %c0_i32 = arith.constant 0 : i32
    %c0_i32_0 = arith.constant 0 : i32
    %c0_i32_1 = arith.constant 0 : i32
    %c0_i32_2 = arith.constant 0 : i32
    return %c0_i32, %c0_i32_0, %c0_i32_1 : i32, i32, i32
  }
  func.func @transform_6(%arg0: i32, %arg1: i32) -> (i32, i32, i32) {
    %c0_i32 = arith.constant 0 : i32
    %c0_i32_0 = arith.constant 0 : i32
    %c0_i32_1 = arith.constant 0 : i32
    %c0_i32_2 = arith.constant 0 : i32
    return %c0_i32, %c0_i32_0, %c0_i32_1 : i32, i32, i32
  }
  func.func @transform_7(%arg0: i32, %arg1: i32) -> (i32, i32) {
    %c0_i32 = arith.constant 0 : i32
    %c0_i32_0 = arith.constant 0 : i32
    %c0_i32_1 = arith.constant 0 : i32
    return %c0_i32, %c0_i32_0 : i32, i32
  }
  func.func @transform_8(%arg0: i32, %arg1: i32) -> (i32, i32) {
    %c0_i32 = arith.constant 0 : i32
    %c0_i32_0 = arith.constant 0 : i32
    %c0_i32_1 = arith.constant 0 : i32
    return %c0_i32, %c0_i32_0 : i32, i32
  }
  func.func @transform_9(%arg0: i32, %arg1: i32) -> (i32, i32) {
    %c0_i32 = arith.constant 0 : i32
    %c0_i32_0 = arith.constant 0 : i32
    %c0_i32_1 = arith.constant 0 : i32
    return %c0_i32, %c0_i32_0 : i32, i32
  }
  func.func @transform_10(%arg0: i32, %arg1: i32) -> (i32, i32) {
    %c0_i32 = arith.constant 0 : i32
    %c0_i32_0 = arith.constant 0 : i32
    %c0_i32_1 = arith.constant 0 : i32
    return %c0_i32, %c0_i32_0 : i32, i32
  }
  func.func @transform_11(%arg0: i32, %arg1: i32) -> (i32, i32) {
    %c0_i32 = arith.constant 0 : i32
    %c0_i32_0 = arith.constant 0 : i32
    %c0_i32_1 = arith.constant 0 : i32
    return %c0_i32, %c0_i32_0 : i32, i32
  }
  func.func @transform_12(%arg0: i32, %arg1: i32) -> (i32, i32) {
    %c0_i32 = arith.constant 0 : i32
    %c0_i32_0 = arith.constant 0 : i32
    %c0_i32_1 = arith.constant 0 : i32
    return %c0_i32, %c0_i32_0 : i32, i32
  }
  func.func @transform_13(%arg0: i32, %arg1: i32) -> (i32, i32) {
    %c0_i32 = arith.constant 0 : i32
    %c0_i32_0 = arith.constant 0 : i32
    %c0_i32_1 = arith.constant 0 : i32
    return %c0_i32, %c0_i32_0 : i32, i32
  }
  func.func @transform_14(%arg0: i32, %arg1: i32) -> (i32, i32, i32) {
    %c0_i32 = arith.constant 0 : i32
    %c0_i32_0 = arith.constant 0 : i32
    return %arg0, %arg1, %c0_i32 : i32, i32, i32
  }
}

</mosaic_0001>

<bundles_post_ra>
// kernel: tpu_custom_call.1
= control target key start
LH: loop header
LB: loop body
LE: loop exit
PB: predicated region body
PF: predicated region fallthrough
CT: control target
= control target key end

     0   :  { %s3909_s0 = inlined_call_operand.vmem [shape: f32[2,8,32], index: 0, kind: input, shape index: {}]   ;;  %s3910_s1 = inlined_call_operand.vmem [shape: f32[1,32], index: 1, kind: input, shape index: {}]   ;;  %s3911_s2 = inlined_call_operand.vmem [shape: f32[1,32], index: 2, kind: input, shape index: {}]   ;;  %s3912_s3 = inlined_call_operand.vmem [shape: f32[4,32,8], index: 3, kind: input, shape index: {}]   ;;  %s3913_s4 = inlined_call_operand.vmem [shape: f32[4,32,8], index: 4, kind: input, shape index: {}]   ;;  %s3914_s5 = inlined_call_operand.vmem [shape: f32[4,32,8], index: 5, kind: input, shape index: {}]   ;;  %s3915_s6 = inlined_call_operand.vmem [shape: f32[4,8,32], index: 6, kind: input, shape index: {}]   ;;  %s3916_s7 = inlined_call_operand.vmem [shape: f32[1,32], index: 7, kind: input, shape index: {}]   ;;  %s3917_s8 = inlined_call_operand.vmem [shape: f32[1,32], index: 8, kind: input, shape index: {}]   ;;  %s3918_s9 = inlined_call_operand.vmem [shape: f32[1,32], index: 9, kind: input, shape index: {}]   ;;  %s3919_s10 = inlined_call_operand.vmem [shape: f32[32,128], index: 10, kind: input, shape index: {}]   ;;  %s3920_s11 = inlined_call_operand.vmem [shape: f32[1,128], index: 11, kind: input, shape index: {}]   ;;  %s3921_s12 = inlined_call_operand.vmem [shape: f32[128,32], index: 12, kind: input, shape index: {}]   ;;  %s3922_s13 = inlined_call_operand.vmem [shape: f32[1,32], index: 13, kind: input, shape index: {}]   ;;  %s3923_s14 = inlined_call_operand.hbm [shape: f32[2,8,32], index: 14, kind: output, shape index: {}]  }
   0x1   :  { %3927 = sst [smem:[#allocation9_spill]] %s3909_s0 }
   0x2   :  { %19 = vsyncpa [#allocation3], 0 }
   0x3   :  { %21 = vsyncpa [#allocation3 + $0x1], 0  ;;  %s3385_s29 = smov 0   ;;  %s3387_s30 = smov 0  }
   0x4   :  { %s3389_s15 = smov 0   ;;  %s3391_s16 = smov 0  }
   0x5   :  { %s3393_s17 = smov 0   ;;  %s3395_s18 = smov 0  }
   0x6 LB: > { %3928 = sst [smem:[#allocation5_spill]] %s3292_s15  ;;  %s2653_s19 = sadd.s32 4294967295, %s3304_s18   ;;  %s3304_s18 = sphi %s3395_s18, %s27_s18   ;;  %s3300_s17 = sphi %s3393_s17, %s3941_s17   ;;  %s3296_s16 = sphi %s3391_s16, %s3937_s16   ;;  %s3292_s15 = sphi %s3389_s15, %s3936_s15   ;;  %s3288_s30 = sphi %s3387_s30, %s3940_s30   ;;  %s3284_s29 = sphi %s3385_s29, %s3939_s29  }
   0x7   : > { %3929 = sst [smem:[#allocation6_spill]] %s3300_s17  ;;  %s2654_s20 = sadd.s32 4294967294, %s3304_s18  }
   0x8   : > { %s39_s21 = sadd.s32 1, %s3300_s17  ;;  %s347_s22 = sadd.s32 1, %s3292_s15 }
   0x9   : > { %p41_p0 = scmp.ge.s32.totalorder %s39_s21, 2  ;;  %p357_p1 = scmp.ne.s32.totalorder %s3292_s15, %s3288_s30 }
   0xa   : > { %p358_p2 = scmp.eq.s32.totalorder %s2653_s19, 1  ;;  %p363_p3 = scmp.ne.s32.totalorder %s3288_s30, %s3284_s29 }
   0xb   : > { %s3943_s21 = smov (%p41_p0, %s39_s21), 0  ;;  %p364_p5 = scmp.eq.s32.totalorder %s2654_s20, 1 }
   0xc   : > { %3930 = sst [smem:[#allocation7_spill]] %s3943_s21  ;;  %p3425_p4 = por %p358_p2, %p357_p1 }
   0xd   : > { %s342_s24 = ssub.s32 %s3300_s17, %s3943_s21  ;;  %p2657_p6 = scmp.ge.s32.totalorder %s3304_s18, 1 }
   0xe   : > { %p345_p7 = scmp.eq.s32.totalorder %s342_s24, 0  ;;  %p3432_p8 = por %p364_p5, %p363_p3 }
   0xf   : > { %p428_p9 = scmp.lt.s32.totalorder %s3304_s18, 3 }
  0x10   : > { %s3438_s26 = scalar_select %p345_p7, %s3292_s15, %s347_s22  }
  0x11   : > { %p429_p10 = pnand %p2657_p6, %p428_p9 }
  0x12   : > { %3933 = sst [smem:[#allocation8_spill]] %s3438_s26  ;;  %p473_p11 = scmp.lt.s32.totalorder (!%p429_p10), %s3296_s16, 1  ;;  %vm485_vm0 = vcmask (!%p429_p10), 261120   ;;  %v516_v4 = vld [vmem:[%s3912_s3] sm:$0xff] (!%p429_p10)  ;;  %v517_v5 = vld [vmem:[%s3912_s3 + $0x8] sm:$0xff] (!%p429_p10)  ;;  %v3306_v9 = vmov (!%p429_p10), 0.0|0.0  }
  0x13   : > { %432 = sbr.rel (%p429_p10) target bundleno = 2037 (0x7f5), region = 76  ;;  %s3934_s0 = sld [smem:[#allocation9_spill]] (!%p429_p10)  ;;  %v528_v6 = vld [vmem:[%s3912_s3 + $0x60] sm:$0xff] (!%p429_p10)  ;;  %v3045_v7 = vpack.c.bf16 (!%p429_p10), %v517_v5, %v516_v4  ;;  %v529_v8 = vld [vmem:[%s3912_s3 + $0x68] sm:$0xff] (!%p429_p10)  ;;  %3044 = vmatprep.subr.bf16.mxu0 (!%p429_p10), %v3306_v9  ;;  %3062 = vmatprep.subr.bf16.mxu1 (!%p429_p10), %v3306_v9  ;;  %v518_v11 = vld [vmem:[%s3912_s3 + $0x10] sm:$0xff] (!%p429_p10)  ;;  %vm3307_vm1 = vmmov (!%p429_p10), 0  }
  0x14   : > { %v3063_v10 = vpack.c.bf16 (!%p429_p10), %v529_v8, %v528_v6  ;;  %v519_v12 = vld [vmem:[%s3912_s3 + $0x18] sm:$0xff] (!%p429_p10)  ;;  %v530_v13 = vld [vmem:[%s3912_s3 + $0x70] sm:$0xff] (!%p429_p10)  ;;  %v3308_v17 = vmov (!%p429_p10), 0.0   ;;  %v2660_v27 = vld [vmem:[%s3910_s1] ss:$0 sm:$0xff] (!%p429_p10)  ;;  %vm1407_vm2 = vcmask (!%p429_p10), 64512  }
  0x15   : > { %3046 = vmatpush3.bf16.msra.mxu0 (!%p429_p10), %v3045_v7  ;;  %v3048_v14 = vpack.c.bf16 (!%p429_p10), %v519_v12, %v518_v11  ;;  %v531_v15 = vld [vmem:[%s3912_s3 + $0x78] sm:$0xff] (!%p429_p10)  ;;  %2814 = vmatprep.mubr.msk.f32.mxu0 (!%p429_p10), %vm3307_vm1, %v3308_v17  ;;  %v520_v28 = vld [vmem:[%s3912_s3 + $0x20] sm:$0xff] (!%p429_p10)  ;;  %v521_v30 = vld [vmem:[%s3912_s3 + $0x28] sm:$0xff] (!%p429_p10)  ;;  %s470_s15 = sand.u32 (!%p429_p10), 1, %s3288_s30   ;;  %s2697_s22 = sshll.u32 (!%p429_p10), %s3296_s16, 7 }
  0x16   : > { %3064 = vmatpush3.bf16.msra.mxu1 (!%p429_p10), %v3063_v10  ;;  %3047 = vmatprep.subr.bf16.mxu0 (!%p429_p10), %v3306_v9  ;;  %v3066_v16 = vpack.c.bf16 (!%p429_p10), %v531_v15, %v530_v13  ;;  %v819_v31 = vld [vmem:[%s3913_s4 + $0x20] sm:$0xff] (!%p429_p10)  ;;  %v820_v32 = vld [vmem:[%s3913_s4 + $0x28] sm:$0xff] (!%p429_p10)  ;;  %v3051_v35 = vpack.c.bf16 (!%p429_p10), %v521_v30, %v520_v28  ;;  %v522_v37 = vld [vmem:[%s3912_s3 + $0x30] sm:$0xff] (!%p429_p10)  ;;  %s2658_s19 = sshll.u32 (!%p429_p10), %s470_s15, 3  ;;  %s2571_s26 = scalar_lea.sflag (!%p429_p10), [#allocation3], %s470_s15 }
  0x17   : > { %3065 = vmatprep.subr.bf16.mxu1 (!%p429_p10), %v3306_v9  ;;  %2847 = vmatprep.mubr.msk.f32.mxu1 (!%p429_p10), %vm3307_vm1, %v3308_v17  ;;  %v2661_v33 = vld [vmem:[%s3911_s2] ss:$0 sm:$0xff] (!%p429_p10)  ;;  %v3075_v36 = vpack.c.bf16 (!%p429_p10), %v820_v32, %v819_v31  ;;  %v523_v39 = vld [vmem:[%s3912_s3 + $0x38] sm:$0xff] (!%p429_p10)  ;;  %v821_v40 = vld [vmem:[%s3913_s4 + $0x30] sm:$0xff] (!%p429_p10)  ;;  %s472_s24 = scalar_lea.vmem (!%p429_p10), [#allocation2], %s2658_s19  ;;  %s3309_s19 = smov (!%p429_p10), [#allocation2]  }
  0x18   : > { %v822_v41 = vld [vmem:[%s3913_s4 + $0x38] sm:$0xff] (!%p429_p10)  ;;  %v3054_v42 = vpack.c.bf16 (!%p429_p10), %v523_v39, %v522_v37  ;;  %v524_v44 = vld [vmem:[%s3912_s3 + $0x40] sm:$0xff] (!%p429_p10)  ;;  %v525_v45 = vld [vmem:[%s3912_s3 + $0x48] sm:$0xff] (!%p429_p10)  ;;  %s3230_s20 = sshll.u32 (!%p429_p10), %s3309_s19, 4  ;;  %s3231_s20 = int_to_ptr.vmem [resolvable:$false] %s3230_s20 }
  0x19   : > { %3049 = vmatpush3.bf16.msra.mxu0 (!%p429_p10), %v3048_v14  ;;  %v3078_v43 = vpack.c.bf16 (!%p429_p10), %v822_v41, %v821_v40  ;;  %v827_v46 = vld [vmem:[%s3913_s4 + $0x60] sm:$0xff] (!%p429_p10)  ;;  %v828_v47 = vld [vmem:[%s3913_s4 + $0x68] sm:$0xff] (!%p429_p10)  ;;  %v3057_v48 = vpack.c.bf16 (!%p429_p10), %v525_v45, %v524_v44  ;;  %v526_v50 = vld [vmem:[%s3912_s3 + $0x50] sm:$0xff] (!%p429_p10)  ;;  %s3232_s17 = scalar_lea.vmem (!%p429_p10), %s3231_s20, 256 }
  0x1a   : > { %s474_s27 = scalar_select %p473_p11, %s3296_s16, 1  ;;  %3067 = vmatpush3.bf16.msra.mxu1 %v3066_v16  ;;  %3050 = vmatprep.subr.bf16.mxu0 %v3306_v9  ;;  %v3087_v49 = vpack.c.bf16 %v828_v47, %v827_v46  ;;  %v527_v51 = vld [vmem:[%s3912_s3 + $0x58] sm:$0xff]  ;;  %v829_v52 = vld [vmem:[%s3913_s4 + $0x70] sm:$0xff]  ;;  %v815_v56 = vld [vmem:[%s3913_s4] sm:$0xff] }
  0x1b   : > { %3074 = vmatprep.subr.bf16.mxu1 %v3306_v9  ;;  %v830_v53 = vld [vmem:[%s3913_s4 + $0x78] sm:$0xff]  ;;  %v3060_v54 = vpack.c.bf16 %v527_v51, %v526_v50  ;;  %v816_v57 = vld [vmem:[%s3913_s4 + $0x8] sm:$0xff]  ;;  %v1115_v58 = vld [vmem:[%s3914_s5 + $0x20] sm:$0xff] }
  0x1c   : > { %s2659_s28 = sshll.u32 %s474_s27, 3  ;;  %v3090_v55 = vpack.c.bf16 %v830_v53, %v829_v52  ;;  %v1116_v59 = vld [vmem:[%s3914_s5 + $0x28] sm:$0xff]  ;;  %v3069_v60 = vpack.c.bf16 %v816_v57, %v815_v56  ;;  %v817_v62 = vld [vmem:[%s3913_s4 + $0x10] sm:$0xff]  ;;  %v818_v63 = vld [vmem:[%s3913_s4 + $0x18] sm:$0xff]  ;;  %s2585_s27 = sshll.u32 %s472_s24, 4  ;;  %s3863_s27 = int_to_ptr.vmem [resolvable:$true] %s2585_s27 }
  0x1d   : > { %s476_s21 = scalar_lea.vmem %s3934_s0, %s2659_s28  ;;  %v3099_v61 = vpack.c.bf16 %v1116_v59, %v1115_v58  ;;  %v823_v5 = vld [vmem:[%s3913_s4 + $0x40] sm:$0xff]  ;;  %v824_v6 = vld [vmem:[%s3913_s4 + $0x48] sm:$0xff]  ;;  %v825_v12 = vld [vmem:[%s3913_s4 + $0x50] sm:$0xff]  ;;  %s3861_s0 = scalar_lea.hbm %s3923_s14, %s2697_s22 }
  0x1e   : > { %v3445_v0 = vld [vmem:[%s476_s21] sm:$0xff]  ;;  %v1124_v8 = vld [vmem:[%s3914_s5 + $0x68] sm:$0xff]  ;;  %v3081_v10 = vpack.c.bf16 %v824_v6, %v823_v5  ;;  %v826_v13 = vld [vmem:[%s3913_s4 + $0x58] sm:$0xff]  ;;  %s3226_s16 = scalar_lea.vmem %s3863_s27, 128  ;;  %p3233_p1 = scmp.lt.s32.totalorder %s3863_s27, %s3231_s20 }
  0x1f   : > { %v486_v1 = vsel %vm485_vm0, %v3445_v0, 0.0  ;;  %v491_v2 = vmul.f32 %v3445_v0, %v3445_v0  ;;  %v1123_v7 = vld [vmem:[%s3914_s5 + $0x60] sm:$0xff]  ;;  %v1125_v14 = vld [vmem:[%s3914_s5 + $0x70] sm:$0xff]  ;;  %v1126_v15 = vld [vmem:[%s3914_s5 + $0x78] sm:$0xff]  ;;  %v3084_v16 = vpack.c.bf16 %v826_v13, %v825_v12  ;;  %p3227_p12 = scmp.ne.s32.totalorder %s3863_s27, %s3226_s16  ;;  %p3234_p2 = scmp.lt.s32.totalorder %s3232_s17, %s3226_s16 }
  0x20   : > { %487 = vadd.xlane.f32.xlu0 %v486_v1  ;;  %v1117_v1 = vld [vmem:[%s3914_s5 + $0x30] sm:$0xff]  ;;  %v3111_v11 = vpack.c.bf16 %v1124_v8, %v1123_v7 }
  0x21   : > { %v492_v3 = vsel %vm485_vm0, %v491_v2, 0.0  ;;  %v1118_v2 = vld [vmem:[%s3914_s5 + $0x38] sm:$0xff]  ;;  %v1121_v28 = vld [vmem:[%s3914_s5 + $0x50] sm:$0xff]  ;;  %p3228_p13 = pnand %p3227_p12, %p3425_p4  ;;  %p3235_p3 = por %p3234_p2, %p3233_p1 }
  0x22   : > { %v3102_v4 = vpack.c.bf16 %v1118_v2, %v1117_v1 }
  0x23   : > { %p3229_p0 = pneg %p3228_p13 }
  0x24   : > { %493 = vadd.xlane.f32.xlu0 %v492_v3  ;;  %v3072_v3 = vpack.c.bf16 %v818_v63, %v817_v62 }
  0x25   : > { %p3236_p5 = pnand %p3235_p3, %p3229_p0 }
  0xad   : > { %v488_v18 = vpop.xlane.xlu0 %487 }
  0xae   : > { %v490_v19 = vmul.f32 0.03125, %v488_v18  ;;  %v3114_v18 = vpack.c.bf16 %v1126_v15, %v1125_v14 }
  0xb0   : > { %v496_v21 = vmul.f32 %v490_v19, %v490_v19  ;;  %v498_v25 = vsub.f32 %v3445_v0, %v490_v19  ;;  %v1111_v19 = vld [vmem:[%s3914_s5] sm:$0xff] }
  0xb1   : > { %v494_v20 = vpop.xlane.xlu0 %493 }
  0xb2   : > { %v495_v22 = vmul.f32 0.03125, %v494_v20  ;;  %v1112_v20 = vld [vmem:[%s3914_s5 + $0x8] sm:$0xff] }
  0xb4   : > { %v497_v23 = vsub.f32 %v495_v22, %v496_v21  ;;  %v3093_v21 = vpack.c.bf16 %v1112_v20, %v1111_v19  ;;  %v1113_v22 = vld [vmem:[%s3914_s5 + $0x10] sm:$0xff] }
  0xb6   : > { %v499_v24 = vadd.f32 1e-05, %v497_v23  ;;  %v1114_v23 = vld [vmem:[%s3914_s5 + $0x18] sm:$0xff] }
  0xb8   : > { %3204 = vrsqrt.f32 %v499_v24  ;;  %v3096_v24 = vpack.c.bf16 %v1114_v23, %v1113_v22 }
  0xc2   : > { %v3205_v26 = vpop.eup %3204 }
  0xc3   : > { %v501_v29 = vmul.f32 %v3205_v26, %v498_v25  ;;  %v1119_v25 = vld [vmem:[%s3914_s5 + $0x40] sm:$0xff]  ;;  %v1120_v26 = vld [vmem:[%s3914_s5 + $0x48] sm:$0xff] }
  0xc5   : > { %v508_v34 = vmul.f32 %v2660_v27, %v501_v29  ;;  %v3105_v27 = vpack.c.bf16 %v1120_v26, %v1119_v25  ;;  %v1122_v29 = vld [vmem:[%s3914_s5 + $0x58] sm:$0xff] }
  0xc6   : > { %v3108_v30 = vpack.c.bf16 %v1122_v29, %v1121_v28 }
  0xc7   : > { %v3508_v38 = vadd.f32 %v2661_v33, %v508_v34 }
  0xc9   : > { %2815 = vmatmul.mubr.msk.f32.vlgmr.msra.gmra.mrb[0].mxu0 %vm485_vm0, %v3508_v38  ;;  %2848 = vmatmul.mubr.msk.f32.vlgmr.msra.gmra.mrb[0].mxu1 %vm485_vm0, %v3508_v38 }
  0xca   : > { %3052 = vmatpush3.bf16.msra.mxu0 %v3051_v35  ;;  %3076 = vmatpush3.bf16.msra.mxu1 %v3075_v36 }
  0xcb   : > { %3053 = vmatprep.subr.bf16.mxu0 %v3306_v9  ;;  %3077 = vmatprep.subr.bf16.mxu1 %v3306_v9 }
  0xcc   : > { %2825 = vmatprep.mubr.msk.f32.mxu0 %vm3307_vm1, %v3308_v17  ;;  %2869 = vmatprep.mubr.msk.f32.mxu1 %vm3307_vm1, %v3308_v17 }
  0xce   : > { %3055 = vmatpush3.bf16.msra.mxu0 %v3054_v42  ;;  %3079 = vmatpush3.bf16.msra.mxu1 %v3078_v43 }
  0xcf   : > { %3056 = vmatprep.subr.bf16.mxu0 %v3306_v9  ;;  %3086 = vmatprep.subr.bf16.mxu1 %v3306_v9 }
  0xd1   : > { %2826 = vmatmul.mubr.msk.f32.vlgmr.msra.gmra.mrb[2].mxu0 %vm485_vm0, %v3508_v38  ;;  %2870 = vmatmul.mubr.msk.f32.vlgmr.msra.gmra.mrb[2].mxu1 %vm485_vm0, %v3508_v38 }
  0xd2   : > { %3058 = vmatpush3.bf16.msra.mxu0 %v3057_v48  ;;  %3088 = vmatpush3.bf16.msra.mxu1 %v3087_v49 }
  0xd3   : > { %3059 = vmatprep.subr.bf16.mxu0 %v3306_v9  ;;  %3089 = vmatprep.subr.bf16.mxu1 %v3306_v9 }
  0xd4   : > { %2836 = vmatprep.mubr.msk.f32.mxu0 %vm3307_vm1, %v3308_v17  ;;  %2891 = vmatprep.mubr.msk.f32.mxu1 %vm3307_vm1, %v3308_v17 }
  0xd6   : > { %3061 = vmatpush3.bf16.msra.mxu0 %v3060_v54  ;;  %3091 = vmatpush3.bf16.msra.mxu1 %v3090_v55 }
  0xd7   : > { %3068 = vmatprep.subr.bf16.mxu0 %v3306_v9  ;;  %3098 = vmatprep.subr.bf16.mxu1 %v3306_v9 }
  0xd9   : > { %2837 = vmatmul.mubr.msk.f32.vlgmr.msra.gmra.mrb[4].mxu0 %vm485_vm0, %v3508_v38  ;;  %2892 = vmatmul.mubr.msk.f32.vlgmr.msra.gmra.mrb[4].mxu1 %vm485_vm0, %v3508_v38 }
  0xda   : > { %3070 = vmatpush3.bf16.msra.mxu0 %v3069_v60  ;;  %3100 = vmatpush3.bf16.msra.mxu1 %v3099_v61 }
  0xdb   : > { %3071 = vmatprep.subr.bf16.mxu0 %v3306_v9  ;;  %3101 = vmatprep.subr.bf16.mxu1 %v3306_v9 }
  0xdc   : > { %2858 = vmatprep.mubr.msk.f32.mxu0 %vm3307_vm1, %v3308_v17  ;;  %2913 = vmatprep.mubr.msk.f32.mxu1 %vm3307_vm1, %v3308_v17 }
  0xde   : > { %3073 = vmatpush3.bf16.msra.mxu0 %v3072_v3  ;;  %3103 = vmatpush3.bf16.msra.mxu1 %v3102_v4 }
  0xdf   : > { %3080 = vmatprep.subr.bf16.mxu0 %v3306_v9  ;;  %3110 = vmatprep.subr.bf16.mxu1 %v3306_v9 }
  0xe1   : > { %2859 = vmatmul.mubr.msk.f32.vlgmr.msra.gmra.mrb[6].mxu0 %vm485_vm0, %v3508_v38  ;;  %2914 = vmatmul.mubr.msk.f32.vlgmr.msra.gmra.mrb[6].mxu1 %vm485_vm0, %v3508_v38 }
  0xe2   : > { %3082 = vmatpush3.bf16.msra.mxu0 %v3081_v10  ;;  %3112 = vmatpush3.bf16.msra.mxu1 %v3111_v11 }
  0xe3   : > { %3083 = vmatprep.subr.bf16.mxu0 %v3306_v9  ;;  %3113 = vmatprep.subr.bf16.mxu1 %v3306_v9 }
  0xe4   : > { %2880 = vmatprep.mubr.msk.f32.mxu0 %vm3307_vm1, %v3308_v17  ;;  %2935 = vmatprep.mubr.msk.f32.mxu1 %vm3307_vm1, %v3308_v17 }
  0xe6   : > { %3085 = vmatpush3.bf16.msra.mxu0 %v3084_v16  ;;  %3115 = vmatpush3.bf16.msra.mxu1 %v3114_v18 }
  0xe7   : > { %3092 = vmatprep.subr.bf16.mxu0 %v3306_v9  ;;  %2953 = vmatprep.subr.mxu1 %v3308_v17 }
  0xe9   : > { %2881 = vmatmul.mubr.msk.f32.vlgmr.msra.gmra.mrb[8].mxu0 %vm485_vm0, %v3508_v38  ;;  %2936 = vmatmul.mubr.msk.f32.vlgmr.msra.gmra.mrb[8].mxu1 %vm485_vm0, %v3508_v38 }
  0xea   : > { %3094 = vmatpush3.bf16.msra.mxu0 %v3093_v21  ;;  %2902 = vmatprep.mubr.msk.f32.mxu0 %vm3307_vm1, %v3308_v17 }
  0xeb   : > { %3095 = vmatprep.subr.bf16.mxu0 %v3306_v9  ;;  %2955 = vmatprep.mubr.msk.f32.mxu1 %vm3307_vm1, %v3308_v17 }
  0xee   : > { %3097 = vmatpush3.bf16.msra.mxu0 %v3096_v24 }
  0xef   : > { %3104 = vmatprep.subr.bf16.mxu0 %v3306_v9 }
  0xf1   : > { %2903 = vmatmul.mubr.msk.f32.vlgmr.msra.gmra.mrb[10].mxu0 %vm485_vm0, %v3508_v38 }
  0xf2   : > { %3106 = vmatpush3.bf16.msra.mxu0 %v3105_v27  ;;  %2924 = vmatprep.mubr.msk.f32.mxu0 %vm3307_vm1, %v3308_v17 }
  0xf3   : > { %3107 = vmatprep.subr.bf16.mxu0 %v3306_v9 }
  0xf6   : > { %3109 = vmatpush3.bf16.msra.mxu0 %v3108_v30 }
  0xf7   : > { %2938 = vmatprep.subr.mxu0 %v3308_v17 }
  0xf9   : > { %2925 = vmatmul.mubr.msk.f32.vlgmr.msra.gmra.mrb[12].mxu0 %vm485_vm0, %v3508_v38 }
  0xfa   : > { %2940 = vmatprep.mubr.msk.f32.mxu0 %vm3307_vm1, %v3308_v17 }
 0x19c   : > { %v601_v31 = vpop.f32.mrb[0].mxu0  ;;  %v811_v32 = vpop.f32.mrb[0].mxu1 }
 0x19d   : > { %v2816_v33 = vpop.f32.mrb[1].mxu0  ;;  %v2849_v34 = vpop.f32.mrb[1].mxu1 }
 0x1a4   : > { %v671_v35 = vpop.f32.mrb[2].mxu0  ;;  %v967_v36 = vpop.f32.mrb[2].mxu1 }
 0x1a5   : > { %v2827_v37 = vpop.f32.mrb[3].mxu0  ;;  %v2871_v39 = vpop.f32.mrb[3].mxu1 }
 0x1a6   : > { %v2048_v39 = vld [vmem:[%s3915_s6] sm:$0xff] }
 0x1ac   : > { %v741_v40 = vpop.f32.mrb[4].mxu0  ;;  %v1107_v41 = vpop.f32.mrb[4].mxu1 }
 0x1ad   : > { %v2838_v42 = vpop.f32.mrb[5].mxu0  ;;  %v2893_v43 = vpop.f32.mrb[5].mxu1  ;;  %2954 = vmatpush3.xpose.msk.msra.mxu1 %vm1407_vm2, %v1107_v41  ;;  %v2050_v41 = vld [vmem:[%s3915_s6 + $0x10] sm:$0xff] }
 0x1ae   : > { %2963 = vmatprep.subr.mxu1 %v3308_v17 }
 0x1b0   : > { %2956 = vmatmul.mubr.msk.f32.vlgmr.msra.gmra.mrb[10].mxu1 %vm1407_vm2, %v811_v32 }
 0x1b1   : > { %2965 = vmatprep.mubr.msk.f32.mxu1 %vm3307_vm1, %v3308_v17 }
 0x1b4   : > { %v897_v38 = vpop.f32.mrb[6].mxu0  ;;  %v1263_v44 = vpop.f32.mrb[6].mxu1 }
 0x1b5   : > { %v2860_v45 = vpop.f32.mrb[7].mxu0  ;;  %v2915_v46 = vpop.f32.mrb[7].mxu1  ;;  %2939 = vmatpush3.xpose.msk.msra.mxu0 %vm1407_vm2, %v897_v38  ;;  %2964 = vmatpush3.msra.mxu1 %v1263_v44  ;;  %v2051_v38 = vld [vmem:[%s3915_s6 + $0x18] sm:$0xff] }
 0x1b6   : > { %2943 = vmatprep.subr.mxu0 %v3308_v17  ;;  %2973 = vmatprep.subr.mxu1 %v3308_v17 }
 0x1b8   : > { %2941 = vmatmul.mubr.msk.f32.vlgmr.msra.gmra.mrb[14].mxu0 %vm1407_vm2, %v601_v31 }
 0x1b9   : > { %2944 = vmatpush3.xpose.msk.msra.mxu0 %vm1407_vm2, %v967_v36  ;;  %2945 = vmatprep.mubr.msk.f32.mxu0 %vm3307_vm1, %v3308_v17 }
 0x1ba   : > { %2948 = vmatprep.subr.mxu0 %v3308_v17 }
 0x1bc   : > { %v1037_v47 = vpop.f32.mrb[8].mxu0  ;;  %v3696_v48 = vpop.f32.mrb[8].mxu1  ;;  %2946 = vmatmul.mubr.msk.f32.vlgmr.msra.gmra.mrb[16].mxu0 %vm1407_vm2, %v671_v35 }
 0x1bd   : > { %v2882_v49 = vpop.f32.mrb[9].mxu0  ;;  %v2937_v50 = vpop.f32.mrb[9].mxu1  ;;  %2949 = vmatpush3.xpose.msk.msra.mxu0 %vm1407_vm2, %v1037_v47  ;;  %2950 = vmatprep.mubr.msk.f32.mxu0 %vm3307_vm1, %v3308_v17 }
 0x1be   : > { %2958 = vmatprep.subr.mxu0 %v3308_v17 }
 0x1c0   : > { %2951 = vmatmul.mubr.msk.f32.vlgmr.msra.gmra.mrb[18].mxu0 %vm1407_vm2, %v741_v40  ;;  %v2049_v40 = vld [vmem:[%s3915_s6 + $0x8] sm:$0xff] }
 0x1c1   : > { %2960 = vmatprep.mubr.msk.f32.mxu0 %vm3307_vm1, %v3308_v17 }
 0x1c4   : > { %v1193_v51 = vpop.f32.mrb[10].mxu0 }
 0x1c5   : > { %v2904_v52 = vpop.f32.mrb[11].mxu0  ;;  %2959 = vmatpush3.msra.mxu0 %v1193_v51 }
 0x1c6   : > { %2968 = vmatprep.subr.mxu0 %v3308_v17 }
 0x1cc   : > { %v1333_v53 = vpop.f32.mrb[12].mxu0 }
 0x1cd   : > { %v2926_v54 = vpop.f32.mrb[13].mxu0 }
 0x283   : > { %v1708_v55 = vpop.f32.mrb[10].mxu1 }
 0x284   : > { %v2957_v56 = vpop.f32.mrb[11].mxu1  ;;  %v1721_v2 = vsel %vm1407_vm2, %v1708_v55, -inf }
 0x28b   : > { %v1480_v57 = vpop.f32.mrb[14].mxu0 }
 0x28c   : > { %v2942_v58 = vpop.f32.mrb[15].mxu0  ;;  %v1712_v59 = vsel %vm1407_vm2, %v1480_v57, -inf }
 0x28d   : > { %1713 = vmax.xlane.f32.xlu1 %v1712_v59 }
 0x28f   : > { %v1556_v60 = vpop.f32.mrb[16].mxu0 }
 0x290   : > { %v2947_v61 = vpop.f32.mrb[17].mxu0  ;;  %v1715_v62 = vsel %vm1407_vm2, %v1556_v60, -inf }
 0x291   : > { %1716 = vmax.xlane.f32.xlu1 %v1715_v62 }
 0x293   : > { %v1632_v63 = vpop.f32.mrb[18].mxu0 }
 0x294   : > { %v2952_v1 = vpop.f32.mrb[19].mxu0  ;;  %v1718_v3 = vsel %vm1407_vm2, %v1632_v63, -inf }
 0x295   : > { %1722 = vmax.xlane.f32.xlu1 %v1721_v2  ;;  %1719 = vmax.xlane.f32.xlu0 %v1718_v3 }
 0x31a   : > { %v1714_v4 = vpop.xlane.xlu1 %1713 }
 0x31b   : > { %v1724_v5 = vsub.f32 %v1480_v57, %v1714_v4 }
 0x31d   : > { %v1728_v6 = vmul.f32 1.442695, %v1724_v5 }
 0x31e   : > { %v1717_v7 = vpop.xlane.xlu1 %1716 }
 0x31f   : > { %3206 = vpow2.f32 %v1728_v6  ;;  %v1725_v8 = vsub.f32 %v1556_v60, %v1717_v7  ;;  %v2388_v7 = vld [vmem:[%s3919_s10] sm:$0xff] }
 0x321   : > { %v1730_v10 = vmul.f32 1.442695, %v1725_v8  ;;  %v2389_v8 = vld [vmem:[%s3919_s10 + $0x8] sm:$0xff] }
 0x322   : > { %v1723_v11 = vpop.xlane.xlu1 %1722  ;;  %v1720_v12 = vpop.xlane.xlu0 %1719 }
 0x323   : > { %3208 = vpow2.f32 %v1730_v10  ;;  %v1727_v13 = vsub.f32 %v1708_v55, %v1723_v11  ;;  %v1726_v14 = vsub.f32 %v1632_v63, %v1720_v12  ;;  %v2390_v10 = vld [vmem:[%s3919_s10 + $0x10] sm:$0xff]  ;;  %v2391_v11 = vld [vmem:[%s3919_s10 + $0x18] sm:$0xff] }
 0x324   : > { %v3120_v12 = vpack.c.bf16 %v2391_v11, %v2390_v10 }
 0x325   : > { %v1734_v15 = vmul.f32 1.442695, %v1727_v13  ;;  %v1732_v16 = vmul.f32 1.442695, %v1726_v14  ;;  %v2476_v13 = vld [vmem:[%s3921_s12] sm:$0xff]  ;;  %v2477_v14 = vld [vmem:[%s3921_s12 + $0x8] sm:$0xff] }
 0x327   : > { %3210 = vpow2.f32 %v1734_v15  ;;  %v2478_v15 = vld [vmem:[%s3921_s12 + $0x10] sm:$0xff] }
 0x328   : > { %3212 = vpow2.f32 %v1732_v16  ;;  %v3123_v16 = vpack.c.bf16 %v2477_v14, %v2476_v13 }
 0x329   : > { %v3207_v18 = vpop.eup %3206 }
 0x32a   : > { %v1736_v19 = vsel %vm1407_vm2, %v3207_v18, 0.0 }
 0x32b   : > { %1737 = vadd.xlane.f32.xlu0 %v1736_v19 }
 0x32d   : > { %v3209_v20 = vpop.eup %3208 }
 0x32e   : > { %v1739_v21 = vsel %vm1407_vm2, %v3209_v20, 0.0 }
 0x32f   : > { %1740 = vadd.xlane.f32.xlu1 %v1739_v21  ;;  %v2481_v21 = vld [vmem:[%s3921_s12 + $0x28] sm:$0xff] }
 0x331   : > { %v3211_v22 = vpop.eup %3210 }
 0x332   : > { %v3213_v23 = vpop.eup %3212  ;;  %v1745_v24 = vsel %vm1407_vm2, %v3211_v22, 0.0 }
 0x333   : > { %1746 = vadd.xlane.f32.xlu1 %v1745_v24  ;;  %v1742_v25 = vsel %vm1407_vm2, %v3213_v23, 0.0 }
 0x334   : > { %1743 = vadd.xlane.f32.xlu0 %v1742_v25 }
 0x3b8   : > { %v1738_v26 = vpop.xlane.xlu0 %1737 }
 0x3b9   : > { %3214 = vrcp.f32 %v1738_v26 }
 0x3bc   : > { %v1741_v27 = vpop.xlane.xlu1 %1740 }
 0x3bd   : > { %3216 = vrcp.f32 %v1741_v27 }
 0x3c0   : > { %v1747_v28 = vpop.xlane.xlu1 %1746 }
 0x3c1   : > { %3218 = vrcp.f32 %v1747_v28  ;;  %v1744_v29 = vpop.xlane.xlu0 %1743 }
 0x3c2   : > { %3220 = vrcp.f32 %v1744_v29 }
 0x3c3   : > { %v3215_v30 = vpop.eup %3214 }
 0x3c4   : > { %v1752_v31 = vmul.f32 %v3215_v30, %v3207_v18  ;;  %v2479_v18 = vld [vmem:[%s3921_s12 + $0x18] sm:$0xff] }
 0x3c5   : > { %v3126_v19 = vpack.c.bf16 %v2479_v18, %v2478_v15 }
 0x3c6   : > { %2961 = vmatmul.mubr.msk.f32.vlgmr.msra.gmra.mrb[20].mxu0 %vm1407_vm2, %v1752_v31 }
 0x3c7   : > { %v3217_v32 = vpop.eup %3216  ;;  %2969 = vmatpush3.msra.mxu0 %v1333_v53  ;;  %2970 = vmatprep.mubr.msk.f32.mxu0 %vm3307_vm1, %v3308_v17 }
 0x3c8   : > { %v1753_v33 = vmul.f32 %v3217_v32, %v3209_v20  ;;  %2978 = vmatprep.subr.mxu0 %v3308_v17  ;;  %v2480_v20 = vld [vmem:[%s3921_s12 + $0x20] sm:$0xff] }
 0x3c9   : > { %v2691_v32 = vld [vmem:[%s3917_s8] ss:$0 sm:$0xff] }
 0x3ca   : > { %2966 = vmatmul.mubr.msk.f32.vlgmr.msra.gmra.mrb[12].mxu1 %vm1407_vm2, %v1753_v33 }
 0x3cb   : > { %v3219_v34 = vpop.eup %3218  ;;  %2974 = vmatpush3.msra.mxu1 %v3696_v48  ;;  %2975 = vmatprep.mubr.msk.f32.mxu1 %vm3307_vm1, %v3308_v17 }
 0x3cc   : > { %v3221_v35 = vpop.eup %3220  ;;  %v1755_v36 = vmul.f32 %v3219_v34, %v3211_v22  ;;  %2983 = vmatprep.subr.mxu1 %v3308_v17  ;;  %v3129_v22 = vpack.c.bf16 %v2481_v21, %v2480_v20  ;;  %v2692_v34 = vld [vmem:[%s3918_s9] ss:$0 sm:$0xff] }
 0x3cd   : > { %v1754_v37 = vmul.f32 %v3221_v35, %v3213_v23 }
 0x3ce   : > { %2976 = vmatmul.mubr.msk.f32.vlgmr.msra.gmra.mrb[14].mxu1 %vm1407_vm2, %v1755_v36 }
 0x3cf   : > { %2971 = vmatmul.mubr.msk.f32.vlgmr.msra.gmra.mrb[22].mxu0 %vm1407_vm2, %v1754_v37  ;;  %2985 = vmatprep.mubr.msk.f32.mxu1 %vm3307_vm1, %v3308_v17  ;;  %v2482_v37 = vld [vmem:[%s3921_s12 + $0x30] sm:$0xff] }
 0x3d0   : > { %2980 = vmatprep.mubr.msk.f32.mxu0 %vm3307_vm1, %v3308_v17  ;;  %2979 = vmatpush3.msra.mxu0 %v2048_v39  ;;  %v2483_v39 = vld [vmem:[%s3921_s12 + $0x38] sm:$0xff] }
 0x3d1   : > { %2988 = vmatprep.subr.mxu0 %v3308_v17  ;;  %2984 = vmatpush3.msra.mxu1 %v2049_v40  ;;  %v3132_v40 = vpack.c.bf16 %v2483_v39, %v2482_v37 }
 0x3d2   : > { %2993 = vmatprep.subr.mxu1 %v3308_v17 }
 0x499   : > { %v1825_v42 = vpop.f32.mrb[20].mxu0 }
 0x49a   : > { %v2962_v43 = vpop.f32.mrb[21].mxu0  ;;  %2981 = vmatmul.mubr.msk.f32.vlgmr.msra.gmra.mrb[24].mxu0 %vm1407_vm2, %v1825_v42  ;;  %v2485_v42 = vld [vmem:[%s3921_s12 + $0x48] sm:$0xff] }
 0x49b   : > { %2989 = vmatpush3.msra.mxu0 %v2050_v41  ;;  %2990 = vmatprep.mubr.msk.f32.mxu0 %vm3307_vm1, %v3308_v17  ;;  %v2484_v41 = vld [vmem:[%s3921_s12 + $0x40] sm:$0xff] }
 0x49c   : > { %3116 = vmatprep.subr.bf16.mxu0 %v3306_v9  ;;  %v3135_v43 = vpack.c.bf16 %v2485_v42, %v2484_v41 }
 0x49d   : > { %v1898_v44 = vpop.f32.mrb[12].mxu1 }
 0x49e   : > { %v2967_v45 = vpop.f32.mrb[13].mxu1  ;;  %2986 = vmatmul.mubr.msk.f32.vlgmr.msra.gmra.mrb[16].mxu1 %vm1407_vm2, %v1898_v44  ;;  %v2487_v44 = vld [vmem:[%s3921_s12 + $0x58] sm:$0xff] }
 0x49f   : > { %2994 = vmatpush3.msra.mxu1 %v2051_v38  ;;  %2995 = vmatprep.mubr.msk.f32.mxu1 %vm3307_vm1, %v3308_v17  ;;  %v2486_v38 = vld [vmem:[%s3921_s12 + $0x50] sm:$0xff] }
 0x4a0   : > { %3122 = vmatprep.subr.bf16.mxu1 %v3306_v9  ;;  %v3138_v45 = vpack.c.bf16 %v2487_v44, %v2486_v38 }
 0x4a1   : > { %v2044_v46 = vpop.f32.mrb[14].mxu1 }
 0x4a2   : > { %v1971_v47 = vpop.f32.mrb[22].mxu0  ;;  %v2977_v48 = vpop.f32.mrb[15].mxu1  ;;  %2996 = vmatmul.mubr.msk.f32.vlgmr.msra.gmra.mrb[18].mxu1 %vm1407_vm2, %v2044_v46  ;;  %v2488_v46 = vld [vmem:[%s3921_s12 + $0x60] sm:$0xff] }
 0x4a3   : > { %v2972_v49 = vpop.f32.mrb[23].mxu0  ;;  %2991 = vmatmul.mubr.msk.f32.vlgmr.msra.gmra.mrb[26].mxu0 %vm1407_vm2, %v1971_v47  ;;  %3041 = vmatprep.mubr.msk.f32.mxu1 %vm3307_vm1, %v3308_v17  ;;  %v2489_v47 = vld [vmem:[%s3921_s12 + $0x68] sm:$0xff] }
 0x4a4   : > { %3006 = vmatprep.mubr.msk.f32.mxu0 %vm3307_vm1, %v3308_v17  ;;  %v2690_v17 = vld [vmem:[%s3916_s7] ss:$0 sm:$0xff]  ;;  %3124 = vmatpush3.bf16.msra.mxu1 %v3123_v16  ;;  %v3141_v48 = vpack.c.bf16 %v2489_v47, %v2488_v46  ;;  %v2490_v49 = vld [vmem:[%s3921_s12 + $0x70] sm:$0xff] }
 0x4a5   : > { %3125 = vmatprep.subr.bf16.mxu1 %v3306_v9 }
 0x4a8   : > { %3127 = vmatpush3.bf16.msra.mxu1 %v3126_v19 }
 0x4a9   : > { %3128 = vmatprep.subr.bf16.mxu1 %v3306_v9 }
 0x4ac   : > { %3130 = vmatpush3.bf16.msra.mxu1 %v3129_v22 }
 0x4ad   : > { %3131 = vmatprep.subr.bf16.mxu1 %v3306_v9 }
 0x4b0   : > { %3133 = vmatpush3.bf16.msra.mxu1 %v3132_v40 }
 0x4b1   : > { %3134 = vmatprep.subr.bf16.mxu1 %v3306_v9 }
 0x4b4   : > { %3136 = vmatpush3.bf16.msra.mxu1 %v3135_v43 }
 0x4b5   : > { %3137 = vmatprep.subr.bf16.mxu1 %v3306_v9 }
 0x4b8   : > { %3139 = vmatpush3.bf16.msra.mxu1 %v3138_v45 }
 0x4b9   : > { %3140 = vmatprep.subr.bf16.mxu1 %v3306_v9 }
 0x4bc   : > { %3142 = vmatpush3.bf16.msra.mxu1 %v3141_v48 }
 0x4bd   : > { %3143 = vmatprep.subr.bf16.mxu1 %v3306_v9 }
 0x56d   : > { %v2121_v50 = vpop.f32.mrb[24].mxu0 }
 0x56e   : > { %v2982_v51 = vpop.f32.mrb[25].mxu0  ;;  %v2344_v53 = vsel %vm485_vm0, %v2121_v50, 0.0  ;;  %v2491_v50 = vld [vmem:[%s3921_s12 + $0x78] sm:$0xff] }
 0x56f   : > { %v3144_v51 = vpack.c.bf16 %v2491_v50, %v2490_v49 }
 0x571   : > { %v2194_v52 = vpop.f32.mrb[16].mxu1  ;;  %3145 = vmatpush3.bf16.msra.mxu1 %v3144_v51 }
 0x572   : > { %v2345_v54 = vsel %vm485_vm0, %v2194_v52, 0.0  ;;  %v2987_v55 = vpop.f32.mrb[17].mxu1  ;;  %v2693_v52 = vld [vmem:[%s3920_s11] ss:$0 sm:$0xff] }
 0x573   : > { %v2346_v56 = vadd.f32 %v2345_v54, %v2344_v53 }
 0x575   : > { %v2340_v57 = vpop.f32.mrb[18].mxu1 }
 0x576   : > { %v2267_v58 = vpop.f32.mrb[26].mxu0  ;;  %v2997_v59 = vpop.f32.mrb[19].mxu1  ;;  %v2349_v63 = vsel %vm485_vm0, %v2340_v57, 0.0 }
 0x577   : > { %v2347_v60 = vsel %vm485_vm0, %v2267_v58, 0.0  ;;  %v2992_v61 = vpop.f32.mrb[27].mxu0 }
 0x578   : > { %v2348_v62 = vadd.f32 %v2347_v60, %v2346_v56  ;;  %v2695_v60 = vld [vmem:[%s3922_s13] ss:$0 sm:$0xff] }
 0x57a   : > { %v2350_v1 = vadd.f32 %v2349_v63, %v2348_v62 }
 0x57c   : > { %v2357_v2 = vadd.f32 %v2690_v17, %v2350_v1 }
 0x57e   : > { %v3766_v3 = vadd.f32 %v2357_v2, %v3445_v0  ;;  %v3117_v0 = vpack.c.bf16 %v2389_v8, %v2388_v7 }
 0x580   : > { %v2359_v4 = vsel %vm485_vm0, %v3766_v3, 0.0  ;;  %v2363_v5 = vmul.f32 %v3766_v3, %v3766_v3  ;;  %3118 = vmatpush3.bf16.msra.mxu0 %v3117_v0 }
 0x581   : > { %2360 = vadd.xlane.f32.xlu0 %v2359_v4  ;;  %3119 = vmatprep.subr.bf16.mxu0 %v3306_v9 }
 0x582   : > { %v2364_v6 = vsel %vm485_vm0, %v2363_v5, 0.0 }
 0x583   : > { %2365 = vadd.xlane.f32.xlu1 %v2364_v6 }
 0x584   : > { %3121 = vmatpush3.bf16.msra.mxu0 %v3120_v12 }
 0x60e   : > { %v2361_v23 = vpop.xlane.xlu0 %2360 }
 0x60f   : > { %v2362_v24 = vmul.f32 0.03125, %v2361_v23 }
 0x610   : > { %v2366_v25 = vpop.xlane.xlu1 %2365 }
 0x611   : > { %v2368_v26 = vmul.f32 %v2362_v24, %v2362_v24  ;;  %v2367_v27 = vmul.f32 0.03125, %v2366_v25  ;;  %v2370_v30 = vsub.f32 %v3766_v3, %v2362_v24 }
 0x613   : > { %v2369_v28 = vsub.f32 %v2367_v27, %v2368_v26 }
 0x615   : > { %v2371_v29 = vadd.f32 1e-05, %v2369_v28 }
 0x617   : > { %3222 = vrsqrt.f32 %v2371_v29 }
 0x621   : > { %v3223_v31 = vpop.eup %3222 }
 0x622   : > { %v2373_v33 = vmul.f32 %v3223_v31, %v2370_v30 }
 0x624   : > { %v2380_v35 = vmul.f32 %v2691_v32, %v2373_v33 }
 0x626   : > { %v2387_v36 = vadd.f32 %v2692_v34, %v2380_v35 }
 0x628   : > { %3007 = vmatmul.mubr.msk.f32.vlgmr.msra.gmra.mrb[28].mxu0 %vm485_vm0, %v2387_v36 }
 0x6fb   : > { %v2467_v53 = vpop.f32.mrb[28].mxu0 }
 0x6fc   : > { %v2468_v54 = vadd.f32 %v2693_v52, %v2467_v53  ;;  %v3008_v55 = vpop.f32.mrb[29].mxu0 }
 0x6fe   : > { %v2472_v9 = vmul.f32 0.70710677, %v2468_v54  ;;  %v2471_v57 = vmul.f32 0.5, %v2468_v54 }
 0x700   : > { %3224 = verf.f32 %v2472_v9 }
 0x70a   : > { %v3225_v56 = vpop.eup %3224 }
 0x70b   : > { %v2474_v58 = vadd.f32 1.0, %v3225_v56 }
 0x70d   : > { %v2475_v59 = vmul.f32 %v2474_v58, %v2471_v57 }
 0x70f   : > { %3042 = vmatmul.mubr.f32.vlgmr.msra.gmra.mrb[20].mxu1 %v2475_v59 }
 0x7e2   : > { %v2564_v61 = vpop.f32.mrb[20].mxu1 }
 0x7e3   : > { %v2565_v62 = vadd.f32 %v2695_v60, %v2564_v61  ;;  %v3043_v17 = vpop.f32.mrb[21].mxu1 }
 0x7e5   : > { %v2568_v63 = vadd.f32 %v2565_v62, %v3766_v3 }
 0x7e7   : > { %2569 = vst.msk [vmem:[%s472_s24] sm:$0xff] %vm485_vm0, %v2568_v63 }
 0x7e8   : > { %3239 = shalt.err (!%p3236_p5)
}
 0x7e9   : > { %s3240_s15 = scalar_lea.hbm %s3861_s0, 128  ;;  %s3244_s21 = scalar_lea.hbm %s3923_s14, 256 }
 0x7ea   : > { %p3241_p6 = scmp.ne.s32.totalorder %s3861_s0, %s3240_s15  ;;  %p3245_p10 = scmp.lt.u32.totalorder %s3861_s0, %s3923_s14 }
 0x7eb   : > { %p3246_p11 = scmp.lt.u32.totalorder %s3244_s21, %s3240_s15  ;;  %p3248_p13 = scmp.lt.u32.totalorder %s3240_s15, %s3861_s0 }
 0x7ec   : > { %p3242_p7 = pnand %p3241_p6, %p3425_p4 }
 0x7ed   : > { %p3247_p12 = por %p3246_p11, %p3245_p10 }
 0x7ee   : > { %p3243_p9 = pneg %p3242_p7 }
 0x7ef   : > { %p3249_p0 = por %p3248_p13, %p3247_p12 }
 0x7f1   : > { %p3250_p1 = pnand %p3249_p0, %p3243_p9 }
 0x7f3   : > { %3253 = shalt.err (!%p3250_p1)
}
 0x7f4   : > { %3146 = dma.vmem_to_hbm [thread:$0]  (%p3425_p4), %s3863_s27, 128, %s3861_s0, %s2571_s26  }
 0x7f5 PF: > { %p3152_p2 = scmp.ge.s32.totalorder %s3304_s18, 2  ;;  %s2597_s16 = sand.u32 1, %s3284_s29  }
 0x7f6   : > { %s2598_s20 = scalar_lea.sflag [#allocation3], %s2597_s16 }
 0x7f7   : > { %p3149_p3 = pnand %p3152_p2, %p3432_p8 }
 0x7f9   : > { %3279 = dma.done.wait (!%p3149_p3), %s2598_s20, 128  }
 0x7fa   : > { %3281 = vsyncadd (!%p3149_p3), %s2598_s20, 4294967168  ;;  %s27_s18 = sadd.s32 1, %s3304_s18   ;;  %s3935_s17 = sld [smem:[#allocation5_spill]] }
 0x7fb   : > { %p24_p5 = scmp.ge.s32.totalorder %s27_s18, 4   ;;  %s3936_s15 = sld [smem:[#allocation8_spill]] }
 0x7fc   : > { %s3937_s16 = sld [smem:[#allocation6_spill]]  ;;  %s3938_s23 = sld [smem:[#allocation7_spill]] }
 0x7fd   : > { %s3939_s29 = smov %s3288_s30  ;;  %26 = sbr.rel (!%p24_p5) target bundleno = 6 (0x6), region = 111 }
 0x800   : > { %s3940_s30 = smov %s3935_s17 }
 0x802   : > { %s3941_s17 = smov %s3938_s23 }
 0x804   :  { %2603 = vsyncpa [#allocation3], 1 }
 0x805   :  { %2605 = vsyncpa [#allocation3 + $0x1], 1 }

// kernel: tpu_custom_call.1
= control target key start
LH: loop header
LB: loop body
LE: loop exit
PB: predicated region body
PF: predicated region fallthrough
CT: control target
= control target key end

     0   :  { %s3913_s0 = inlined_call_operand.vmem [shape: f32[2,8,32], index: 0, kind: input, shape index: {}]   ;;  %s3914_s1 = inlined_call_operand.vmem [shape: f32[1,32], index: 1, kind: input, shape index: {}]   ;;  %s3915_s2 = inlined_call_operand.vmem [shape: f32[1,32], index: 2, kind: input, shape index: {}]   ;;  %s3916_s3 = inlined_call_operand.vmem [shape: f32[4,32,8], index: 3, kind: input, shape index: {}]   ;;  %s3917_s4 = inlined_call_operand.vmem [shape: f32[4,32,8], index: 4, kind: input, shape index: {}]   ;;  %s3918_s5 = inlined_call_operand.vmem [shape: f32[4,32,8], index: 5, kind: input, shape index: {}]   ;;  %s3919_s6 = inlined_call_operand.vmem [shape: f32[4,8,32], index: 6, kind: input, shape index: {}]   ;;  %s3920_s7 = inlined_call_operand.vmem [shape: f32[1,32], index: 7, kind: input, shape index: {}]   ;;  %s3921_s8 = inlined_call_operand.vmem [shape: f32[1,32], index: 8, kind: input, shape index: {}]   ;;  %s3922_s9 = inlined_call_operand.vmem [shape: f32[1,32], index: 9, kind: input, shape index: {}]   ;;  %s3923_s10 = inlined_call_operand.vmem [shape: f32[32,128], index: 10, kind: input, shape index: {}]   ;;  %s3924_s11 = inlined_call_operand.vmem [shape: f32[1,128], index: 11, kind: input, shape index: {}]   ;;  %s3925_s12 = inlined_call_operand.vmem [shape: f32[128,32], index: 12, kind: input, shape index: {}]   ;;  %s3926_s13 = inlined_call_operand.vmem [shape: f32[1,32], index: 13, kind: input, shape index: {}]   ;;  %s3927_s14 = inlined_call_operand.hbm [shape: f32[2,8,32], index: 14, kind: output, shape index: {}]  }
   0x1   :  { %3931 = sst [smem:[#allocation9_spill]] %s3913_s0 }
   0x2   :  { %19 = vsyncpa [#allocation3], 0 }
   0x3   :  { %21 = vsyncpa [#allocation3 + $0x1], 0  ;;  %s3389_s29 = smov 0   ;;  %s3391_s30 = smov 0  }
   0x4   :  { %s3393_s15 = smov 0   ;;  %s3395_s16 = smov 0  }
   0x5   :  { %s3397_s17 = smov 0   ;;  %s3399_s18 = smov 0  }
   0x6 LB: > { %3932 = sst [smem:[#allocation5_spill]] %s3296_s15  ;;  %s2657_s19 = sadd.s32 4294967295, %s3308_s18   ;;  %s3308_s18 = sphi %s3399_s18, %s27_s18   ;;  %s3304_s17 = sphi %s3397_s17, %s3945_s17   ;;  %s3300_s16 = sphi %s3395_s16, %s3941_s16   ;;  %s3296_s15 = sphi %s3393_s15, %s3940_s15   ;;  %s3292_s30 = sphi %s3391_s30, %s3944_s30   ;;  %s3288_s29 = sphi %s3389_s29, %s3943_s29  }
   0x7   : > { %3933 = sst [smem:[#allocation6_spill]] %s3304_s17  ;;  %s2658_s20 = sadd.s32 4294967294, %s3308_s18  }
   0x8   : > { %s39_s21 = sadd.s32 1, %s3304_s17  ;;  %s347_s22 = sadd.s32 1, %s3296_s15 }
   0x9   : > { %p41_p0 = scmp.ge.s32.totalorder %s39_s21, 2  ;;  %p357_p1 = scmp.ne.s32.totalorder %s3296_s15, %s3292_s30 }
   0xa   : > { %p358_p2 = scmp.eq.s32.totalorder %s2657_s19, 1  ;;  %p363_p3 = scmp.ne.s32.totalorder %s3292_s30, %s3288_s29 }
   0xb   : > { %s3947_s21 = smov (%p41_p0, %s39_s21), 0  ;;  %p364_p5 = scmp.eq.s32.totalorder %s2658_s20, 1 }
   0xc   : > { %3934 = sst [smem:[#allocation7_spill]] %s3947_s21  ;;  %p3429_p4 = por %p358_p2, %p357_p1 }
   0xd   : > { %s342_s24 = ssub.s32 %s3304_s17, %s3947_s21  ;;  %p2661_p6 = scmp.ge.s32.totalorder %s3308_s18, 1 }
   0xe   : > { %p345_p7 = scmp.eq.s32.totalorder %s342_s24, 0  ;;  %p3436_p8 = por %p364_p5, %p363_p3 }
   0xf   : > { %p428_p9 = scmp.lt.s32.totalorder %s3308_s18, 3 }
  0x10   : > { %s3442_s26 = scalar_select %p345_p7, %s3296_s15, %s347_s22  }
  0x11   : > { %p429_p10 = pnand %p2661_p6, %p428_p9 }
  0x12   : > { %3937 = sst [smem:[#allocation8_spill]] %s3442_s26  ;;  %p473_p11 = scmp.lt.s32.totalorder (!%p429_p10), %s3300_s16, 1  ;;  %vm485_vm0 = vcmask (!%p429_p10), 261120   ;;  %v516_v4 = vld [vmem:[%s3916_s3] sm:$0xff] (!%p429_p10)  ;;  %v517_v5 = vld [vmem:[%s3916_s3 + $0x8] sm:$0xff] (!%p429_p10)  ;;  %v3310_v9 = vmov (!%p429_p10), 0.0|0.0  }
  0x13   : > { %432 = sbr.rel (%p429_p10) target bundleno = 2047 (0x7ff), region = 76  ;;  %s3938_s0 = sld [smem:[#allocation9_spill]] (!%p429_p10)  ;;  %v528_v6 = vld [vmem:[%s3916_s3 + $0x60] sm:$0xff] (!%p429_p10)  ;;  %v3049_v7 = vpack.c.bf16 (!%p429_p10), %v517_v5, %v516_v4  ;;  %v529_v8 = vld [vmem:[%s3916_s3 + $0x68] sm:$0xff] (!%p429_p10)  ;;  %3048 = vmatprep.subr.bf16.mxu0 (!%p429_p10), %v3310_v9  ;;  %3066 = vmatprep.subr.bf16.mxu1 (!%p429_p10), %v3310_v9  ;;  %v518_v11 = vld [vmem:[%s3916_s3 + $0x10] sm:$0xff] (!%p429_p10)  ;;  %vm3311_vm1 = vmmov (!%p429_p10), 0  }
  0x14   : > { %v3067_v10 = vpack.c.bf16 (!%p429_p10), %v529_v8, %v528_v6  ;;  %v519_v12 = vld [vmem:[%s3916_s3 + $0x18] sm:$0xff] (!%p429_p10)  ;;  %v530_v13 = vld [vmem:[%s3916_s3 + $0x70] sm:$0xff] (!%p429_p10)  ;;  %v3312_v17 = vmov (!%p429_p10), 0.0   ;;  %v2664_v27 = vld [vmem:[%s3914_s1] ss:$0 sm:$0xff] (!%p429_p10)  ;;  %vm1407_vm2 = vcmask (!%p429_p10), 64512  }
  0x15   : > { %3050 = vmatpush3.bf16.msra.mxu0 (!%p429_p10), %v3049_v7  ;;  %v3052_v14 = vpack.c.bf16 (!%p429_p10), %v519_v12, %v518_v11  ;;  %v531_v15 = vld [vmem:[%s3916_s3 + $0x78] sm:$0xff] (!%p429_p10)  ;;  %2818 = vmatprep.mubr.msk.f32.mxu0 (!%p429_p10), %vm3311_vm1, %v3312_v17  ;;  %v520_v28 = vld [vmem:[%s3916_s3 + $0x20] sm:$0xff] (!%p429_p10)  ;;  %v521_v30 = vld [vmem:[%s3916_s3 + $0x28] sm:$0xff] (!%p429_p10)  ;;  %s470_s15 = sand.u32 (!%p429_p10), 1, %s3292_s30   ;;  %s2701_s22 = sshll.u32 (!%p429_p10), %s3300_s16, 7 }
  0x16   : > { %3068 = vmatpush3.bf16.msra.mxu1 (!%p429_p10), %v3067_v10  ;;  %3051 = vmatprep.subr.bf16.mxu0 (!%p429_p10), %v3310_v9  ;;  %v3070_v16 = vpack.c.bf16 (!%p429_p10), %v531_v15, %v530_v13  ;;  %v819_v31 = vld [vmem:[%s3917_s4 + $0x20] sm:$0xff] (!%p429_p10)  ;;  %v820_v32 = vld [vmem:[%s3917_s4 + $0x28] sm:$0xff] (!%p429_p10)  ;;  %v3055_v35 = vpack.c.bf16 (!%p429_p10), %v521_v30, %v520_v28  ;;  %v522_v37 = vld [vmem:[%s3916_s3 + $0x30] sm:$0xff] (!%p429_p10)  ;;  %s2662_s19 = sshll.u32 (!%p429_p10), %s470_s15, 3  ;;  %s2575_s26 = scalar_lea.sflag (!%p429_p10), [#allocation3], %s470_s15 }
  0x17   : > { %3069 = vmatprep.subr.bf16.mxu1 (!%p429_p10), %v3310_v9  ;;  %2851 = vmatprep.mubr.msk.f32.mxu1 (!%p429_p10), %vm3311_vm1, %v3312_v17  ;;  %v2665_v33 = vld [vmem:[%s3915_s2] ss:$0 sm:$0xff] (!%p429_p10)  ;;  %v3079_v36 = vpack.c.bf16 (!%p429_p10), %v820_v32, %v819_v31  ;;  %v523_v39 = vld [vmem:[%s3916_s3 + $0x38] sm:$0xff] (!%p429_p10)  ;;  %v821_v40 = vld [vmem:[%s3917_s4 + $0x30] sm:$0xff] (!%p429_p10)  ;;  %s472_s24 = scalar_lea.vmem (!%p429_p10), [#allocation2], %s2662_s19  ;;  %s3313_s19 = smov (!%p429_p10), [#allocation2]  }
  0x18   : > { %v822_v41 = vld [vmem:[%s3917_s4 + $0x38] sm:$0xff] (!%p429_p10)  ;;  %v3058_v42 = vpack.c.bf16 (!%p429_p10), %v523_v39, %v522_v37  ;;  %v524_v44 = vld [vmem:[%s3916_s3 + $0x40] sm:$0xff] (!%p429_p10)  ;;  %v525_v45 = vld [vmem:[%s3916_s3 + $0x48] sm:$0xff] (!%p429_p10)  ;;  %s3234_s20 = sshll.u32 (!%p429_p10), %s3313_s19, 4  ;;  %s3235_s20 = int_to_ptr.vmem [resolvable:$false] %s3234_s20 }
  0x19   : > { %3053 = vmatpush3.bf16.msra.mxu0 (!%p429_p10), %v3052_v14  ;;  %v3082_v43 = vpack.c.bf16 (!%p429_p10), %v822_v41, %v821_v40  ;;  %v827_v46 = vld [vmem:[%s3917_s4 + $0x60] sm:$0xff] (!%p429_p10)  ;;  %v828_v47 = vld [vmem:[%s3917_s4 + $0x68] sm:$0xff] (!%p429_p10)  ;;  %v3061_v48 = vpack.c.bf16 (!%p429_p10), %v525_v45, %v524_v44  ;;  %v526_v50 = vld [vmem:[%s3916_s3 + $0x50] sm:$0xff] (!%p429_p10)  ;;  %s3236_s17 = scalar_lea.vmem (!%p429_p10), %s3235_s20, 256 }
  0x1a   : > { %s474_s27 = scalar_select %p473_p11, %s3300_s16, 1  ;;  %3071 = vmatpush3.bf16.msra.mxu1 %v3070_v16  ;;  %3054 = vmatprep.subr.bf16.mxu0 %v3310_v9  ;;  %v3091_v49 = vpack.c.bf16 %v828_v47, %v827_v46  ;;  %v527_v51 = vld [vmem:[%s3916_s3 + $0x58] sm:$0xff]  ;;  %v829_v52 = vld [vmem:[%s3917_s4 + $0x70] sm:$0xff]  ;;  %v815_v56 = vld [vmem:[%s3917_s4] sm:$0xff] }
  0x1b   : > { %3078 = vmatprep.subr.bf16.mxu1 %v3310_v9  ;;  %v830_v53 = vld [vmem:[%s3917_s4 + $0x78] sm:$0xff]  ;;  %v3064_v54 = vpack.c.bf16 %v527_v51, %v526_v50  ;;  %v816_v57 = vld [vmem:[%s3917_s4 + $0x8] sm:$0xff]  ;;  %v1115_v58 = vld [vmem:[%s3918_s5 + $0x20] sm:$0xff] }
  0x1c   : > { %s2663_s28 = sshll.u32 %s474_s27, 3  ;;  %v3094_v55 = vpack.c.bf16 %v830_v53, %v829_v52  ;;  %v1116_v59 = vld [vmem:[%s3918_s5 + $0x28] sm:$0xff]  ;;  %v3073_v60 = vpack.c.bf16 %v816_v57, %v815_v56  ;;  %v817_v62 = vld [vmem:[%s3917_s4 + $0x10] sm:$0xff]  ;;  %v818_v63 = vld [vmem:[%s3917_s4 + $0x18] sm:$0xff]  ;;  %s2589_s27 = sshll.u32 %s472_s24, 4  ;;  %s3867_s27 = int_to_ptr.vmem [resolvable:$true] %s2589_s27 }
  0x1d   : > { %s476_s21 = scalar_lea.vmem %s3938_s0, %s2663_s28  ;;  %v3103_v61 = vpack.c.bf16 %v1116_v59, %v1115_v58  ;;  %v823_v5 = vld [vmem:[%s3917_s4 + $0x40] sm:$0xff]  ;;  %v824_v6 = vld [vmem:[%s3917_s4 + $0x48] sm:$0xff]  ;;  %v825_v12 = vld [vmem:[%s3917_s4 + $0x50] sm:$0xff]  ;;  %s3865_s0 = scalar_lea.hbm %s3927_s14, %s2701_s22 }
  0x1e   : > { %v3449_v0 = vld [vmem:[%s476_s21] sm:$0xff]  ;;  %v1124_v8 = vld [vmem:[%s3918_s5 + $0x68] sm:$0xff]  ;;  %v3085_v10 = vpack.c.bf16 %v824_v6, %v823_v5  ;;  %v826_v13 = vld [vmem:[%s3917_s4 + $0x58] sm:$0xff]  ;;  %s3230_s16 = scalar_lea.vmem %s3867_s27, 128  ;;  %p3237_p1 = scmp.lt.s32.totalorder %s3867_s27, %s3235_s20 }
  0x1f   : > { %v486_v1 = vsel %vm485_vm0, %v3449_v0, 0.0  ;;  %v491_v2 = vmul.f32 %v3449_v0, %v3449_v0  ;;  %v1123_v7 = vld [vmem:[%s3918_s5 + $0x60] sm:$0xff]  ;;  %v1125_v14 = vld [vmem:[%s3918_s5 + $0x70] sm:$0xff]  ;;  %v1126_v15 = vld [vmem:[%s3918_s5 + $0x78] sm:$0xff]  ;;  %v3088_v16 = vpack.c.bf16 %v826_v13, %v825_v12  ;;  %p3231_p12 = scmp.ne.s32.totalorder %s3867_s27, %s3230_s16  ;;  %p3238_p2 = scmp.lt.s32.totalorder %s3236_s17, %s3230_s16 }
  0x20   : > { %487 = vadd.xlane.f32.xlu0 %v486_v1  ;;  %v1117_v1 = vld [vmem:[%s3918_s5 + $0x30] sm:$0xff]  ;;  %v3115_v11 = vpack.c.bf16 %v1124_v8, %v1123_v7 }
  0x21   : > { %v492_v3 = vsel %vm485_vm0, %v491_v2, 0.0  ;;  %v1118_v2 = vld [vmem:[%s3918_s5 + $0x38] sm:$0xff]  ;;  %v1121_v28 = vld [vmem:[%s3918_s5 + $0x50] sm:$0xff]  ;;  %p3232_p13 = pnand %p3231_p12, %p3429_p4  ;;  %p3239_p3 = por %p3238_p2, %p3237_p1 }
  0x22   : > { %v3106_v4 = vpack.c.bf16 %v1118_v2, %v1117_v1 }
  0x23   : > { %p3233_p0 = pneg %p3232_p13 }
  0x24   : > { %493 = vadd.xlane.f32.xlu0 %v492_v3  ;;  %v3076_v3 = vpack.c.bf16 %v818_v63, %v817_v62 }
  0x25   : > { %p3240_p5 = pnand %p3239_p3, %p3233_p0 }
  0xad   : > { %v488_v18 = vpop.xlane.xlu0 %487 }
  0xae   : > { %v490_v19 = vmul.f32 0.03125, %v488_v18  ;;  %v3118_v18 = vpack.c.bf16 %v1126_v15, %v1125_v14 }
  0xb0   : > { %v496_v21 = vmul.f32 %v490_v19, %v490_v19  ;;  %v498_v25 = vsub.f32 %v3449_v0, %v490_v19  ;;  %v1111_v19 = vld [vmem:[%s3918_s5] sm:$0xff] }
  0xb1   : > { %v494_v20 = vpop.xlane.xlu0 %493 }
  0xb2   : > { %v495_v22 = vmul.f32 0.03125, %v494_v20  ;;  %v1112_v20 = vld [vmem:[%s3918_s5 + $0x8] sm:$0xff] }
  0xb4   : > { %v497_v23 = vsub.f32 %v495_v22, %v496_v21  ;;  %v3097_v21 = vpack.c.bf16 %v1112_v20, %v1111_v19  ;;  %v1113_v22 = vld [vmem:[%s3918_s5 + $0x10] sm:$0xff] }
  0xb6   : > { %v499_v24 = vadd.f32 1e-05, %v497_v23  ;;  %v1114_v23 = vld [vmem:[%s3918_s5 + $0x18] sm:$0xff] }
  0xb8   : > { %3208 = vrsqrt.f32 %v499_v24  ;;  %v3100_v24 = vpack.c.bf16 %v1114_v23, %v1113_v22 }
  0xc2   : > { %v3209_v26 = vpop.eup %3208 }
  0xc3   : > { %v501_v29 = vmul.f32 %v3209_v26, %v498_v25  ;;  %v1119_v25 = vld [vmem:[%s3918_s5 + $0x40] sm:$0xff]  ;;  %v1120_v26 = vld [vmem:[%s3918_s5 + $0x48] sm:$0xff] }
  0xc5   : > { %v508_v34 = vmul.f32 %v2664_v27, %v501_v29  ;;  %v3109_v27 = vpack.c.bf16 %v1120_v26, %v1119_v25  ;;  %v1122_v29 = vld [vmem:[%s3918_s5 + $0x58] sm:$0xff] }
  0xc6   : > { %v3112_v30 = vpack.c.bf16 %v1122_v29, %v1121_v28 }
  0xc7   : > { %v3512_v38 = vadd.f32 %v2665_v33, %v508_v34 }
  0xc9   : > { %2819 = vmatmul.mubr.msk.f32.vlgmr.msra.gmra.mrb[0].mxu0 %vm485_vm0, %v3512_v38  ;;  %2852 = vmatmul.mubr.msk.f32.vlgmr.msra.gmra.mrb[0].mxu1 %vm485_vm0, %v3512_v38 }
  0xca   : > { %3056 = vmatpush3.bf16.msra.mxu0 %v3055_v35  ;;  %3080 = vmatpush3.bf16.msra.mxu1 %v3079_v36 }
  0xcb   : > { %3057 = vmatprep.subr.bf16.mxu0 %v3310_v9  ;;  %3081 = vmatprep.subr.bf16.mxu1 %v3310_v9 }
  0xcc   : > { %2829 = vmatprep.mubr.msk.f32.mxu0 %vm3311_vm1, %v3312_v17  ;;  %2873 = vmatprep.mubr.msk.f32.mxu1 %vm3311_vm1, %v3312_v17 }
  0xce   : > { %3059 = vmatpush3.bf16.msra.mxu0 %v3058_v42  ;;  %3083 = vmatpush3.bf16.msra.mxu1 %v3082_v43 }
  0xcf   : > { %3060 = vmatprep.subr.bf16.mxu0 %v3310_v9  ;;  %3090 = vmatprep.subr.bf16.mxu1 %v3310_v9 }
  0xd1   : > { %2830 = vmatmul.mubr.msk.f32.vlgmr.msra.gmra.mrb[2].mxu0 %vm485_vm0, %v3512_v38  ;;  %2874 = vmatmul.mubr.msk.f32.vlgmr.msra.gmra.mrb[2].mxu1 %vm485_vm0, %v3512_v38 }
  0xd2   : > { %3062 = vmatpush3.bf16.msra.mxu0 %v3061_v48  ;;  %3092 = vmatpush3.bf16.msra.mxu1 %v3091_v49 }
  0xd3   : > { %3063 = vmatprep.subr.bf16.mxu0 %v3310_v9  ;;  %3093 = vmatprep.subr.bf16.mxu1 %v3310_v9 }
  0xd4   : > { %2840 = vmatprep.mubr.msk.f32.mxu0 %vm3311_vm1, %v3312_v17  ;;  %2895 = vmatprep.mubr.msk.f32.mxu1 %vm3311_vm1, %v3312_v17 }
  0xd6   : > { %3065 = vmatpush3.bf16.msra.mxu0 %v3064_v54  ;;  %3095 = vmatpush3.bf16.msra.mxu1 %v3094_v55 }
  0xd7   : > { %3072 = vmatprep.subr.bf16.mxu0 %v3310_v9  ;;  %3102 = vmatprep.subr.bf16.mxu1 %v3310_v9 }
  0xd9   : > { %2841 = vmatmul.mubr.msk.f32.vlgmr.msra.gmra.mrb[4].mxu0 %vm485_vm0, %v3512_v38  ;;  %2896 = vmatmul.mubr.msk.f32.vlgmr.msra.gmra.mrb[4].mxu1 %vm485_vm0, %v3512_v38 }
  0xda   : > { %3074 = vmatpush3.bf16.msra.mxu0 %v3073_v60  ;;  %3104 = vmatpush3.bf16.msra.mxu1 %v3103_v61 }
  0xdb   : > { %3075 = vmatprep.subr.bf16.mxu0 %v3310_v9  ;;  %3105 = vmatprep.subr.bf16.mxu1 %v3310_v9 }
  0xdc   : > { %2862 = vmatprep.mubr.msk.f32.mxu0 %vm3311_vm1, %v3312_v17  ;;  %2917 = vmatprep.mubr.msk.f32.mxu1 %vm3311_vm1, %v3312_v17 }
  0xde   : > { %3077 = vmatpush3.bf16.msra.mxu0 %v3076_v3  ;;  %3107 = vmatpush3.bf16.msra.mxu1 %v3106_v4 }
  0xdf   : > { %3084 = vmatprep.subr.bf16.mxu0 %v3310_v9  ;;  %3114 = vmatprep.subr.bf16.mxu1 %v3310_v9 }
  0xe1   : > { %2863 = vmatmul.mubr.msk.f32.vlgmr.msra.gmra.mrb[6].mxu0 %vm485_vm0, %v3512_v38  ;;  %2918 = vmatmul.mubr.msk.f32.vlgmr.msra.gmra.mrb[6].mxu1 %vm485_vm0, %v3512_v38 }
  0xe2   : > { %3086 = vmatpush3.bf16.msra.mxu0 %v3085_v10  ;;  %3116 = vmatpush3.bf16.msra.mxu1 %v3115_v11 }
  0xe3   : > { %3087 = vmatprep.subr.bf16.mxu0 %v3310_v9  ;;  %3117 = vmatprep.subr.bf16.mxu1 %v3310_v9 }
  0xe4   : > { %2884 = vmatprep.mubr.msk.f32.mxu0 %vm3311_vm1, %v3312_v17  ;;  %2939 = vmatprep.mubr.msk.f32.mxu1 %vm3311_vm1, %v3312_v17 }
  0xe6   : > { %3089 = vmatpush3.bf16.msra.mxu0 %v3088_v16  ;;  %3119 = vmatpush3.bf16.msra.mxu1 %v3118_v18 }
  0xe7   : > { %3096 = vmatprep.subr.bf16.mxu0 %v3310_v9  ;;  %2957 = vmatprep.subr.mxu1 %v3312_v17 }
  0xe9   : > { %2885 = vmatmul.mubr.msk.f32.vlgmr.msra.gmra.mrb[8].mxu0 %vm485_vm0, %v3512_v38  ;;  %2940 = vmatmul.mubr.msk.f32.vlgmr.msra.gmra.mrb[8].mxu1 %vm485_vm0, %v3512_v38 }
  0xea   : > { %3098 = vmatpush3.bf16.msra.mxu0 %v3097_v21  ;;  %2906 = vmatprep.mubr.msk.f32.mxu0 %vm3311_vm1, %v3312_v17 }
  0xeb   : > { %3099 = vmatprep.subr.bf16.mxu0 %v3310_v9  ;;  %2959 = vmatprep.mubr.msk.f32.mxu1 %vm3311_vm1, %v3312_v17 }
  0xee   : > { %3101 = vmatpush3.bf16.msra.mxu0 %v3100_v24 }
  0xef   : > { %3108 = vmatprep.subr.bf16.mxu0 %v3310_v9 }
  0xf1   : > { %2907 = vmatmul.mubr.msk.f32.vlgmr.msra.gmra.mrb[10].mxu0 %vm485_vm0, %v3512_v38 }
  0xf2   : > { %3110 = vmatpush3.bf16.msra.mxu0 %v3109_v27  ;;  %2928 = vmatprep.mubr.msk.f32.mxu0 %vm3311_vm1, %v3312_v17 }
  0xf3   : > { %3111 = vmatprep.subr.bf16.mxu0 %v3310_v9 }
  0xf6   : > { %3113 = vmatpush3.bf16.msra.mxu0 %v3112_v30 }
  0xf7   : > { %2942 = vmatprep.subr.mxu0 %v3312_v17 }
  0xf9   : > { %2929 = vmatmul.mubr.msk.f32.vlgmr.msra.gmra.mrb[12].mxu0 %vm485_vm0, %v3512_v38 }
  0xfa   : > { %2944 = vmatprep.mubr.msk.f32.mxu0 %vm3311_vm1, %v3312_v17 }
 0x19c   : > { %v601_v31 = vpop.f32.mrb[0].mxu0  ;;  %v811_v32 = vpop.f32.mrb[0].mxu1 }
 0x19d   : > { %v2820_v33 = vpop.f32.mrb[1].mxu0  ;;  %v2853_v34 = vpop.f32.mrb[1].mxu1 }
 0x1a4   : > { %v671_v35 = vpop.f32.mrb[2].mxu0  ;;  %v967_v36 = vpop.f32.mrb[2].mxu1 }
 0x1a5   : > { %v2831_v37 = vpop.f32.mrb[3].mxu0  ;;  %v2875_v39 = vpop.f32.mrb[3].mxu1 }
 0x1a6   : > { %v2048_v39 = vld [vmem:[%s3919_s6] sm:$0xff] }
 0x1ac   : > { %v741_v40 = vpop.f32.mrb[4].mxu0  ;;  %v1107_v41 = vpop.f32.mrb[4].mxu1 }
 0x1ad   : > { %v2842_v42 = vpop.f32.mrb[5].mxu0  ;;  %v2897_v43 = vpop.f32.mrb[5].mxu1  ;;  %2958 = vmatpush3.xpose.msk.msra.mxu1 %vm1407_vm2, %v1107_v41  ;;  %v2050_v41 = vld [vmem:[%s3919_s6 + $0x10] sm:$0xff] }
 0x1ae   : > { %2967 = vmatprep.subr.mxu1 %v3312_v17 }
 0x1b0   : > { %2960 = vmatmul.mubr.msk.f32.vlgmr.msra.gmra.mrb[10].mxu1 %vm1407_vm2, %v811_v32 }
 0x1b1   : > { %2969 = vmatprep.mubr.msk.f32.mxu1 %vm3311_vm1, %v3312_v17 }
 0x1b4   : > { %v897_v38 = vpop.f32.mrb[6].mxu0  ;;  %v1263_v44 = vpop.f32.mrb[6].mxu1 }
 0x1b5   : > { %v2864_v45 = vpop.f32.mrb[7].mxu0  ;;  %v2919_v46 = vpop.f32.mrb[7].mxu1  ;;  %2943 = vmatpush3.xpose.msk.msra.mxu0 %vm1407_vm2, %v897_v38  ;;  %2968 = vmatpush3.msra.mxu1 %v1263_v44  ;;  %v2051_v38 = vld [vmem:[%s3919_s6 + $0x18] sm:$0xff] }
 0x1b6   : > { %2947 = vmatprep.subr.mxu0 %v3312_v17  ;;  %2977 = vmatprep.subr.mxu1 %v3312_v17 }
 0x1b8   : > { %2945 = vmatmul.mubr.msk.f32.vlgmr.msra.gmra.mrb[14].mxu0 %vm1407_vm2, %v601_v31 }
 0x1b9   : > { %2948 = vmatpush3.xpose.msk.msra.mxu0 %vm1407_vm2, %v967_v36  ;;  %2949 = vmatprep.mubr.msk.f32.mxu0 %vm3311_vm1, %v3312_v17 }
 0x1ba   : > { %2952 = vmatprep.subr.mxu0 %v3312_v17 }
 0x1bc   : > { %v1037_v47 = vpop.f32.mrb[8].mxu0  ;;  %v3700_v48 = vpop.f32.mrb[8].mxu1  ;;  %2950 = vmatmul.mubr.msk.f32.vlgmr.msra.gmra.mrb[16].mxu0 %vm1407_vm2, %v671_v35 }
 0x1bd   : > { %v2886_v49 = vpop.f32.mrb[9].mxu0  ;;  %v2941_v50 = vpop.f32.mrb[9].mxu1  ;;  %2953 = vmatpush3.xpose.msk.msra.mxu0 %vm1407_vm2, %v1037_v47  ;;  %2954 = vmatprep.mubr.msk.f32.mxu0 %vm3311_vm1, %v3312_v17 }
 0x1be   : > { %2962 = vmatprep.subr.mxu0 %v3312_v17 }
 0x1c0   : > { %2955 = vmatmul.mubr.msk.f32.vlgmr.msra.gmra.mrb[18].mxu0 %vm1407_vm2, %v741_v40  ;;  %v2049_v40 = vld [vmem:[%s3919_s6 + $0x8] sm:$0xff] }
 0x1c1   : > { %2964 = vmatprep.mubr.msk.f32.mxu0 %vm3311_vm1, %v3312_v17 }
 0x1c4   : > { %v1193_v51 = vpop.f32.mrb[10].mxu0 }
 0x1c5   : > { %v2908_v52 = vpop.f32.mrb[11].mxu0  ;;  %2963 = vmatpush3.msra.mxu0 %v1193_v51 }
 0x1c6   : > { %2972 = vmatprep.subr.mxu0 %v3312_v17 }
 0x1cc   : > { %v1333_v53 = vpop.f32.mrb[12].mxu0 }
 0x1cd   : > { %v2930_v54 = vpop.f32.mrb[13].mxu0 }
 0x283   : > { %v1708_v55 = vpop.f32.mrb[10].mxu1 }
 0x284   : > { %v2961_v56 = vpop.f32.mrb[11].mxu1  ;;  %v1721_v2 = vsel %vm1407_vm2, %v1708_v55, -inf }
 0x28b   : > { %v1480_v57 = vpop.f32.mrb[14].mxu0 }
 0x28c   : > { %v2946_v58 = vpop.f32.mrb[15].mxu0  ;;  %v1712_v59 = vsel %vm1407_vm2, %v1480_v57, -inf }
 0x28d   : > { %1713 = vmax.xlane.f32.xlu1 %v1712_v59 }
 0x28f   : > { %v1556_v60 = vpop.f32.mrb[16].mxu0 }
 0x290   : > { %v2951_v61 = vpop.f32.mrb[17].mxu0  ;;  %v1715_v62 = vsel %vm1407_vm2, %v1556_v60, -inf }
 0x291   : > { %1716 = vmax.xlane.f32.xlu1 %v1715_v62 }
 0x293   : > { %v1632_v63 = vpop.f32.mrb[18].mxu0 }
 0x294   : > { %v2956_v1 = vpop.f32.mrb[19].mxu0  ;;  %v1718_v3 = vsel %vm1407_vm2, %v1632_v63, -inf }
 0x295   : > { %1722 = vmax.xlane.f32.xlu1 %v1721_v2  ;;  %1719 = vmax.xlane.f32.xlu0 %v1718_v3 }
 0x31a   : > { %v1714_v4 = vpop.xlane.xlu1 %1713 }
 0x31b   : > { %v1724_v5 = vsub.f32 %v1480_v57, %v1714_v4 }
 0x31d   : > { %v1728_v6 = vmul.f32 1.442695, %v1724_v5 }
 0x31e   : > { %v1717_v7 = vpop.xlane.xlu1 %1716 }
 0x31f   : > { %3210 = vpow2.f32 %v1728_v6  ;;  %v1725_v8 = vsub.f32 %v1556_v60, %v1717_v7  ;;  %v2388_v7 = vld [vmem:[%s3923_s10] sm:$0xff] }
 0x321   : > { %v1730_v10 = vmul.f32 1.442695, %v1725_v8  ;;  %v2389_v8 = vld [vmem:[%s3923_s10 + $0x8] sm:$0xff] }
 0x322   : > { %v1723_v11 = vpop.xlane.xlu1 %1722  ;;  %v1720_v12 = vpop.xlane.xlu0 %1719 }
 0x323   : > { %3212 = vpow2.f32 %v1730_v10  ;;  %v1727_v13 = vsub.f32 %v1708_v55, %v1723_v11  ;;  %v1726_v14 = vsub.f32 %v1632_v63, %v1720_v12  ;;  %v2390_v10 = vld [vmem:[%s3923_s10 + $0x10] sm:$0xff]  ;;  %v2391_v11 = vld [vmem:[%s3923_s10 + $0x18] sm:$0xff] }
 0x324   : > { %v3124_v12 = vpack.c.bf16 %v2391_v11, %v2390_v10 }
 0x325   : > { %v1734_v15 = vmul.f32 1.442695, %v1727_v13  ;;  %v1732_v16 = vmul.f32 1.442695, %v1726_v14  ;;  %v2480_v13 = vld [vmem:[%s3925_s12] sm:$0xff]  ;;  %v2481_v14 = vld [vmem:[%s3925_s12 + $0x8] sm:$0xff] }
 0x327   : > { %3214 = vpow2.f32 %v1734_v15  ;;  %v3127_v15 = vpack.c.bf16 %v2481_v14, %v2480_v13 }
 0x328   : > { %3216 = vpow2.f32 %v1732_v16 }
 0x329   : > { %v3211_v18 = vpop.eup %3210 }
 0x32a   : > { %v1736_v19 = vsel %vm1407_vm2, %v3211_v18, 0.0 }
 0x32b   : > { %1737 = vadd.xlane.f32.xlu0 %v1736_v19 }
 0x32d   : > { %v3213_v20 = vpop.eup %3212 }
 0x32e   : > { %v1739_v21 = vsel %vm1407_vm2, %v3213_v20, 0.0 }
 0x32f   : > { %1740 = vadd.xlane.f32.xlu1 %v1739_v21 }
 0x331   : > { %v3215_v22 = vpop.eup %3214 }
 0x332   : > { %v3217_v23 = vpop.eup %3216  ;;  %v1745_v24 = vsel %vm1407_vm2, %v3215_v22, 0.0 }
 0x333   : > { %1746 = vadd.xlane.f32.xlu1 %v1745_v24  ;;  %v1742_v25 = vsel %vm1407_vm2, %v3217_v23, 0.0 }
 0x334   : > { %1743 = vadd.xlane.f32.xlu0 %v1742_v25 }
 0x3b8   : > { %v1738_v26 = vpop.xlane.xlu0 %1737 }
 0x3b9   : > { %3218 = vrcp.f32 %v1738_v26  ;;  %v2695_v26 = vld [vmem:[%s3921_s8] ss:$0 sm:$0xff] }
 0x3bc   : > { %v1741_v27 = vpop.xlane.xlu1 %1740 }
 0x3bd   : > { %3220 = vrcp.f32 %v1741_v27 }
 0x3c0   : > { %v1747_v28 = vpop.xlane.xlu1 %1746 }
 0x3c1   : > { %3222 = vrcp.f32 %v1747_v28  ;;  %v1744_v29 = vpop.xlane.xlu0 %1743  ;;  %v2696_v28 = vld [vmem:[%s3922_s9] ss:$0 sm:$0xff] }
 0x3c2   : > { %3224 = vrcp.f32 %v1744_v29 }
 0x3c3   : > { %v3219_v30 = vpop.eup %3218 }
 0x3c4   : > { %v1752_v31 = vmul.f32 %v3219_v30, %v3211_v18 }
 0x3c6   : > { %2965 = vmatmul.mubr.msk.f32.vlgmr.msra.gmra.mrb[20].mxu0 %vm1407_vm2, %v1752_v31  ;;  %v2482_v31 = vld [vmem:[%s3925_s12 + $0x10] sm:$0xff] }
 0x3c7   : > { %v3221_v32 = vpop.eup %3220  ;;  %2973 = vmatpush3.msra.mxu0 %v1333_v53  ;;  %2974 = vmatprep.mubr.msk.f32.mxu0 %vm3311_vm1, %v3312_v17 }
 0x3c8   : > { %v1753_v33 = vmul.f32 %v3221_v32, %v3213_v20  ;;  %2982 = vmatprep.subr.mxu0 %v3312_v17  ;;  %v2483_v32 = vld [vmem:[%s3925_s12 + $0x18] sm:$0xff] }
 0x3ca   : > { %2970 = vmatmul.mubr.msk.f32.vlgmr.msra.gmra.mrb[12].mxu1 %vm1407_vm2, %v1753_v33  ;;  %v3130_v33 = vpack.c.bf16 %v2483_v32, %v2482_v31 }
 0x3cb   : > { %v3223_v34 = vpop.eup %3222  ;;  %2978 = vmatpush3.msra.mxu1 %v3700_v48  ;;  %2979 = vmatprep.mubr.msk.f32.mxu1 %vm3311_vm1, %v3312_v17 }
 0x3cc   : > { %v3225_v35 = vpop.eup %3224  ;;  %v1755_v36 = vmul.f32 %v3223_v34, %v3215_v22  ;;  %2987 = vmatprep.subr.mxu1 %v3312_v17  ;;  %v2484_v34 = vld [vmem:[%s3925_s12 + $0x20] sm:$0xff] }
 0x3cd   : > { %v1754_v37 = vmul.f32 %v3225_v35, %v3217_v23  ;;  %v2485_v35 = vld [vmem:[%s3925_s12 + $0x28] sm:$0xff] }
 0x3ce   : > { %2980 = vmatmul.mubr.msk.f32.vlgmr.msra.gmra.mrb[14].mxu1 %vm1407_vm2, %v1755_v36  ;;  %v3133_v36 = vpack.c.bf16 %v2485_v35, %v2484_v34 }
 0x3cf   : > { %2975 = vmatmul.mubr.msk.f32.vlgmr.msra.gmra.mrb[22].mxu0 %vm1407_vm2, %v1754_v37  ;;  %2989 = vmatprep.mubr.msk.f32.mxu1 %vm3311_vm1, %v3312_v17  ;;  %v2486_v37 = vld [vmem:[%s3925_s12 + $0x30] sm:$0xff] }
 0x3d0   : > { %2984 = vmatprep.mubr.msk.f32.mxu0 %vm3311_vm1, %v3312_v17  ;;  %2983 = vmatpush3.msra.mxu0 %v2048_v39  ;;  %v2487_v39 = vld [vmem:[%s3925_s12 + $0x38] sm:$0xff] }
 0x3d1   : > { %2992 = vmatprep.subr.mxu0 %v3312_v17  ;;  %2988 = vmatpush3.msra.mxu1 %v2049_v40  ;;  %v3136_v40 = vpack.c.bf16 %v2487_v39, %v2486_v37 }
 0x3d2   : > { %2997 = vmatprep.subr.mxu1 %v3312_v17 }
 0x499   : > { %v1825_v42 = vpop.f32.mrb[20].mxu0 }
 0x49a   : > { %v2966_v43 = vpop.f32.mrb[21].mxu0  ;;  %2985 = vmatmul.mubr.msk.f32.vlgmr.msra.gmra.mrb[24].mxu0 %vm1407_vm2, %v1825_v42  ;;  %v2489_v42 = vld [vmem:[%s3925_s12 + $0x48] sm:$0xff] }
 0x49b   : > { %2993 = vmatpush3.msra.mxu0 %v2050_v41  ;;  %2994 = vmatprep.mubr.msk.f32.mxu0 %vm3311_vm1, %v3312_v17  ;;  %v2488_v41 = vld [vmem:[%s3925_s12 + $0x40] sm:$0xff] }
 0x49c   : > { %3120 = vmatprep.subr.bf16.mxu0 %v3310_v9  ;;  %v3139_v43 = vpack.c.bf16 %v2489_v42, %v2488_v41 }
 0x49d   : > { %v1898_v44 = vpop.f32.mrb[12].mxu1 }
 0x49e   : > { %v2971_v45 = vpop.f32.mrb[13].mxu1  ;;  %2990 = vmatmul.mubr.msk.f32.vlgmr.msra.gmra.mrb[16].mxu1 %vm1407_vm2, %v1898_v44  ;;  %v2491_v44 = vld [vmem:[%s3925_s12 + $0x58] sm:$0xff] }
 0x49f   : > { %2998 = vmatpush3.msra.mxu1 %v2051_v38  ;;  %2999 = vmatprep.mubr.msk.f32.mxu1 %vm3311_vm1, %v3312_v17  ;;  %v2490_v38 = vld [vmem:[%s3925_s12 + $0x50] sm:$0xff] }
 0x4a0   : > { %3126 = vmatprep.subr.bf16.mxu1 %v3310_v9  ;;  %v3142_v45 = vpack.c.bf16 %v2491_v44, %v2490_v38 }
 0x4a1   : > { %v2044_v46 = vpop.f32.mrb[14].mxu1 }
 0x4a2   : > { %v1971_v47 = vpop.f32.mrb[22].mxu0  ;;  %v2981_v48 = vpop.f32.mrb[15].mxu1  ;;  %3000 = vmatmul.mubr.msk.f32.vlgmr.msra.gmra.mrb[18].mxu1 %vm1407_vm2, %v2044_v46  ;;  %v2492_v46 = vld [vmem:[%s3925_s12 + $0x60] sm:$0xff] }
 0x4a3   : > { %v2976_v49 = vpop.f32.mrb[23].mxu0  ;;  %2995 = vmatmul.mubr.msk.f32.vlgmr.msra.gmra.mrb[26].mxu0 %vm1407_vm2, %v1971_v47  ;;  %3045 = vmatprep.mubr.msk.f32.mxu1 %vm3311_vm1, %v3312_v17  ;;  %v2493_v47 = vld [vmem:[%s3925_s12 + $0x68] sm:$0xff] }
 0x4a4   : > { %3010 = vmatprep.mubr.msk.f32.mxu0 %vm3311_vm1, %v3312_v17  ;;  %v2694_v17 = vld [vmem:[%s3920_s7] ss:$0 sm:$0xff]  ;;  %3128 = vmatpush3.bf16.msra.mxu1 %v3127_v15  ;;  %v3145_v48 = vpack.c.bf16 %v2493_v47, %v2492_v46  ;;  %v2494_v49 = vld [vmem:[%s3925_s12 + $0x70] sm:$0xff] }
 0x4a5   : > { %3129 = vmatprep.subr.bf16.mxu1 %v3310_v9 }
 0x4a8   : > { %3131 = vmatpush3.bf16.msra.mxu1 %v3130_v33 }
 0x4a9   : > { %3132 = vmatprep.subr.bf16.mxu1 %v3310_v9 }
 0x4ac   : > { %3134 = vmatpush3.bf16.msra.mxu1 %v3133_v36 }
 0x4ad   : > { %3135 = vmatprep.subr.bf16.mxu1 %v3310_v9 }
 0x4b0   : > { %3137 = vmatpush3.bf16.msra.mxu1 %v3136_v40 }
 0x4b1   : > { %3138 = vmatprep.subr.bf16.mxu1 %v3310_v9 }
 0x4b4   : > { %3140 = vmatpush3.bf16.msra.mxu1 %v3139_v43 }
 0x4b5   : > { %3141 = vmatprep.subr.bf16.mxu1 %v3310_v9 }
 0x4b8   : > { %3143 = vmatpush3.bf16.msra.mxu1 %v3142_v45 }
 0x4b9   : > { %3144 = vmatprep.subr.bf16.mxu1 %v3310_v9 }
 0x4bc   : > { %3146 = vmatpush3.bf16.msra.mxu1 %v3145_v48 }
 0x4bd   : > { %3147 = vmatprep.subr.bf16.mxu1 %v3310_v9 }
 0x56d   : > { %v2121_v50 = vpop.f32.mrb[24].mxu0 }
 0x56e   : > { %v2986_v51 = vpop.f32.mrb[25].mxu0  ;;  %v2344_v53 = vsel %vm485_vm0, %v2121_v50, 0.0  ;;  %v2495_v50 = vld [vmem:[%s3925_s12 + $0x78] sm:$0xff] }
 0x56f   : > { %v3148_v51 = vpack.c.bf16 %v2495_v50, %v2494_v49 }
 0x571   : > { %v2194_v52 = vpop.f32.mrb[16].mxu1  ;;  %3149 = vmatpush3.bf16.msra.mxu1 %v3148_v51 }
 0x572   : > { %v2345_v54 = vsel %vm485_vm0, %v2194_v52, 0.0  ;;  %v2991_v55 = vpop.f32.mrb[17].mxu1  ;;  %v2697_v52 = vld [vmem:[%s3924_s11] ss:$0 sm:$0xff] }
 0x573   : > { %v2346_v56 = vadd.f32 %v2345_v54, %v2344_v53 }
 0x575   : > { %v2340_v57 = vpop.f32.mrb[18].mxu1 }
 0x576   : > { %v2267_v58 = vpop.f32.mrb[26].mxu0  ;;  %v3001_v59 = vpop.f32.mrb[19].mxu1  ;;  %v2349_v63 = vsel %vm485_vm0, %v2340_v57, 0.0 }
 0x577   : > { %v2347_v60 = vsel %vm485_vm0, %v2267_v58, 0.0  ;;  %v2996_v61 = vpop.f32.mrb[27].mxu0 }
 0x578   : > { %v2348_v62 = vadd.f32 %v2347_v60, %v2346_v56 }
 0x57a   : > { %v2350_v1 = vadd.f32 %v2349_v63, %v2348_v62  ;;  %v2699_v63 = vld [vmem:[%s3926_s13] ss:$0 sm:$0xff] }
 0x57c   : > { %v2357_v2 = vadd.f32 %v2694_v17, %v2350_v1 }
 0x57e   : > { %v3770_v3 = vadd.f32 %v2357_v2, %v3449_v0  ;;  %v3121_v0 = vpack.c.bf16 %v2389_v8, %v2388_v7 }
 0x580   : > { %v2359_v4 = vsel %vm485_vm0, %v3770_v3, 0.0  ;;  %v2363_v5 = vmul.f32 %v3770_v3, %v3770_v3  ;;  %3122 = vmatpush3.bf16.msra.mxu0 %v3121_v0 }
 0x581   : > { %2360 = vadd.xlane.f32.xlu0 %v2359_v4  ;;  %3123 = vmatprep.subr.bf16.mxu0 %v3310_v9 }
 0x582   : > { %v2364_v6 = vsel %vm485_vm0, %v2363_v5, 0.0 }
 0x583   : > { %2365 = vadd.xlane.f32.xlu1 %v2364_v6 }
 0x584   : > { %3125 = vmatpush3.bf16.msra.mxu0 %v3124_v12 }
 0x60e   : > { %v2361_v16 = vpop.xlane.xlu0 %2360 }
 0x60f   : > { %v2362_v18 = vmul.f32 0.03125, %v2361_v16 }
 0x610   : > { %v2366_v19 = vpop.xlane.xlu1 %2365 }
 0x611   : > { %v2368_v20 = vmul.f32 %v2362_v18, %v2362_v18  ;;  %v2367_v21 = vmul.f32 0.03125, %v2366_v19  ;;  %v2370_v24 = vsub.f32 %v3770_v3, %v2362_v18 }
 0x613   : > { %v2369_v22 = vsub.f32 %v2367_v21, %v2368_v20 }
 0x615   : > { %v2371_v23 = vadd.f32 1e-05, %v2369_v22 }
 0x617   : > { %3226 = vrsqrt.f32 %v2371_v23 }
 0x621   : > { %v3227_v25 = vpop.eup %3226 }
 0x622   : > { %v2373_v27 = vmul.f32 %v3227_v25, %v2370_v24 }
 0x624   : > { %v2380_v29 = vmul.f32 %v2695_v26, %v2373_v27 }
 0x626   : > { %v2387_v30 = vadd.f32 %v2696_v28, %v2380_v29 }
 0x628   : > { %3011 = vmatmul.mubr.msk.f32.vlgmr.msra.gmra.mrb[28].mxu0 %vm485_vm0, %v2387_v30 }
 0x6fb   : > { %v2467_v53 = vpop.f32.mrb[28].mxu0 }
 0x6fc   : > { %v2468_v54 = vadd.f32 %v2697_v52, %v2467_v53  ;;  %v3012_v55 = vpop.f32.mrb[29].mxu0 }
 0x6fe   : > { %v2471_v56 = vmul.f32 %v2468_v54, %v2468_v54 }
 0x700   : > { %v2472_v57 = vmul.f32 %v2471_v56, %v2468_v54 }
 0x702   : > { %v2473_v58 = vmul.f32 0.044715, %v2472_v57 }
 0x704   : > { %v2474_v59 = vadd.f32 %v2473_v58, %v2468_v54 }
 0x706   : > { %v2475_v60 = vmul.f32 0.7978846, %v2474_v59 }
 0x708   : > { %3228 = vtanh.f32 %v2475_v60 }
 0x712   : > { %v3229_v61 = vpop.eup %3228 }
 0x713   : > { %v2477_v62 = vadd.f32 1.0, %v3229_v61 }
 0x715   : > { %v2478_v17 = vmul.f32 0.5, %v2477_v62 }
 0x717   : > { %v2479_v9 = vmul.f32 %v2478_v17, %v2468_v54 }
 0x719   : > { %3046 = vmatmul.mubr.f32.vlgmr.msra.gmra.mrb[20].mxu1 %v2479_v9 }
 0x7ec   : > { %v2568_v1 = vpop.f32.mrb[20].mxu1 }
 0x7ed   : > { %v2569_v2 = vadd.f32 %v2699_v63, %v2568_v1  ;;  %v3047_v4 = vpop.f32.mrb[21].mxu1 }
 0x7ef   : > { %v2572_v5 = vadd.f32 %v2569_v2, %v3770_v3 }
 0x7f1   : > { %2573 = vst.msk [vmem:[%s472_s24] sm:$0xff] %vm485_vm0, %v2572_v5 }
 0x7f2   : > { %3243 = shalt.err (!%p3240_p5)
}
 0x7f3   : > { %s3244_s15 = scalar_lea.hbm %s3865_s0, 128  ;;  %s3248_s21 = scalar_lea.hbm %s3927_s14, 256 }
 0x7f4   : > { %p3245_p6 = scmp.ne.s32.totalorder %s3865_s0, %s3244_s15  ;;  %p3249_p10 = scmp.lt.u32.totalorder %s3865_s0, %s3927_s14 }
 0x7f5   : > { %p3250_p11 = scmp.lt.u32.totalorder %s3248_s21, %s3244_s15  ;;  %p3252_p13 = scmp.lt.u32.totalorder %s3244_s15, %s3865_s0 }
 0x7f6   : > { %p3246_p7 = pnand %p3245_p6, %p3429_p4 }
 0x7f7   : > { %p3251_p12 = por %p3250_p11, %p3249_p10 }
 0x7f8   : > { %p3247_p9 = pneg %p3246_p7 }
 0x7f9   : > { %p3253_p0 = por %p3252_p13, %p3251_p12 }
 0x7fb   : > { %p3254_p1 = pnand %p3253_p0, %p3247_p9 }
 0x7fd   : > { %3257 = shalt.err (!%p3254_p1)
}
 0x7fe   : > { %3150 = dma.vmem_to_hbm [thread:$0]  (%p3429_p4), %s3867_s27, 128, %s3865_s0, %s2575_s26  }
 0x7ff PF: > { %p3156_p2 = scmp.ge.s32.totalorder %s3308_s18, 2  ;;  %s2601_s16 = sand.u32 1, %s3288_s29  }
 0x800   : > { %s2602_s20 = scalar_lea.sflag [#allocation3], %s2601_s16 }
 0x801   : > { %p3153_p3 = pnand %p3156_p2, %p3436_p8 }
 0x803   : > { %3283 = dma.done.wait (!%p3153_p3), %s2602_s20, 128  }
 0x804   : > { %3285 = vsyncadd (!%p3153_p3), %s2602_s20, 4294967168  ;;  %s27_s18 = sadd.s32 1, %s3308_s18   ;;  %s3939_s17 = sld [smem:[#allocation5_spill]] }
 0x805   : > { %p24_p5 = scmp.ge.s32.totalorder %s27_s18, 4   ;;  %s3940_s15 = sld [smem:[#allocation8_spill]] }
 0x806   : > { %s3941_s16 = sld [smem:[#allocation6_spill]]  ;;  %s3942_s23 = sld [smem:[#allocation7_spill]] }
 0x807   : > { %s3943_s29 = smov %s3292_s30  ;;  %26 = sbr.rel (!%p24_p5) target bundleno = 6 (0x6), region = 111 }
 0x80a   : > { %s3944_s30 = smov %s3939_s17 }
 0x80c   : > { %s3945_s17 = smov %s3942_s23 }
 0x80e   :  { %2607 = vsyncpa [#allocation3], 1 }
 0x80f   :  { %2609 = vsyncpa [#allocation3 + $0x1], 1 }

</bundles_post_ra>
